<compile_context>
chip_gen: v6e
topology: v6e:2x2x1
jax: 0.10.0
libtpu: 0.0.40
codegen_flags: <defaults>
</compile_context>

<pallas_src>
import jax
import jax.numpy as jnp
from jax.experimental import pallas as pl
from jax.experimental.pallas import tpu as pltpu

# ---- synthetic "bert-base-multilingual-uncased"-like config (small) ----------
B = 2          # batch
S = 8          # sequence length
H = 32         # hidden size
NH = 4         # num attention heads
HD = H // NH   # head dim
FF = 64        # intermediate (FFN) size
VOCAB = 100    # vocab size
NLAYERS = 2    # encoder layers
NOUT = 1       # noutputs of SentencePairClassifier
EPS = 1e-12    # BERT LayerNorm eps


def _layernorm(x, g, b):
    mu = jnp.mean(x, axis=-1, keepdims=True)
    var = jnp.mean((x - mu) ** 2, axis=-1, keepdims=True)
    return (x - mu) * jax.lax.rsqrt(var + EPS) * g + b


# ----------------------------- fused Pallas kernel -----------------------------
def fused_forward_kernel(x_ref, bias_ref, eg_ref, eb_ref,
                         wqkv_ref, bqkv_ref, wo_ref, bo_ref,
                         ln1g_ref, ln1b_ref, wf1_ref, bf1_ref,
                         wf2_ref, bf2_ref, ln2g_ref, ln2b_ref,
                         wp_ref, bp_ref,
                         pooled_ref):
    # x: flattened token activations (B*S, H), f32
    x = _layernorm(x_ref[...], eg_ref[...], eb_ref[...])
    bias = bias_ref[...]                       # (B, S, S) additive mask bias
    scale = 1.0 / (HD ** 0.5)

    for l in range(NLAYERS):                   # static unroll; weights resident in VMEM
        wqkv = wqkv_ref[l]                     # (H, 3H) bf16
        wo_l = wo_ref[l]                       # (H, H)  bf16

        # fused QKV projection on the flattened batch: one (16 x 32) @ (32 x 96)
        qkv = jnp.dot(x.astype(jnp.bfloat16), wqkv,
                      preferred_element_type=jnp.float32) + bqkv_ref[l]   # (B*S, 3H)

        attn = jnp.zeros((B * S, H), jnp.float32)
        for h in range(NH):                    # static unroll over heads
            lo = h * HD
            qh = qkv[:, lo:lo + HD].reshape(B, S, HD)
            kh = qkv[:, H + lo:H + lo + HD].reshape(B, S, HD)
            vh = qkv[:, 2 * H + lo:2 * H + lo + HD].reshape(B, S, HD)

            s = jnp.einsum('bqd,bkd->bqk',
                           qh.astype(jnp.bfloat16), kh.astype(jnp.bfloat16),
                           preferred_element_type=jnp.float32) * scale + bias
            s = s - jnp.max(s, axis=-1, keepdims=True)
            p = jnp.exp(s)
            p = p * pl.reciprocal(jnp.sum(p, axis=-1, keepdims=True), approx=True)

            ctx = jnp.einsum('bqk,bkd->bqd',
                             p.astype(jnp.bfloat16), vh.astype(jnp.bfloat16),
                             preferred_element_type=jnp.float32)          # (B, S, HD)

            # fold the output projection per head -> no lane-axis concat of heads
            attn = attn + jnp.dot(ctx.reshape(B * S, HD).astype(jnp.bfloat16),
                                  wo_l[lo:lo + HD, :],
                                  preferred_element_type=jnp.float32)
        attn = attn + bo_ref[l]

        # residual + LayerNorm 1
        x = _layernorm(x + attn, ln1g_ref[l], ln1b_ref[l])

        # FFN
        ff = jnp.dot(x.astype(jnp.bfloat16), wf1_ref[l],
                     preferred_element_type=jnp.float32) + bf1_ref[l]
        # TODO(synk): HF BERT uses exact erf GELU; erf lowering in Mosaic is not
        # guaranteed, so the tanh approximation is used (tiny numeric drift).
        ff = jax.nn.gelu(ff, approximate=True)
        ff = jnp.dot(ff.astype(jnp.bfloat16), wf2_ref[l],
                     preferred_element_type=jnp.float32) + bf2_ref[l]

        # residual + LayerNorm 2
        x = _layernorm(x + ff, ln2g_ref[l], ln2b_ref[l])

    # pooler: first token of each sequence -> tanh(x0 @ Wp + bp), lane-dense (B, H)
    x0 = jnp.concatenate([x[b * S:b * S + 1, :] for b in range(B)], axis=0)  # (B, H)
    pooled_ref[...] = jnp.tanh(
        jnp.dot(x0.astype(jnp.bfloat16), wp_ref[...],
                preferred_element_type=jnp.float32) + bp_ref[...])


def _full_spec(a):
    # whole array as one VMEM block (last two dims equal full dims -> allowed)
    return pl.BlockSpec(a.shape, lambda i, n=a.ndim: (0,) * n)


def fused_encoder_pooler(x_flat, bias, p):
    args = (x_flat, bias, p["emb_ln_g"], p["emb_ln_b"],
            p["wqkv"], p["bqkv"], p["wo"], p["bo"],
            p["ln1_g"], p["ln1_b"], p["wf1"], p["bf1"],
            p["wf2"], p["bf2"], p["ln2_g"], p["ln2_b"],
            p["pool_w"], p["pool_b"])
    out = jax.ShapeDtypeStruct((B, H), jnp.float32)
    return pl.pallas_call(
        fused_forward_kernel,
        out_shape=out,
        grid=(1,),                                 # single step: everything fused
        in_specs=[_full_spec(a) for a in args],
        out_specs=pl.BlockSpec((B, H), lambda i: (0, 0)),
        compiler_params=pltpu.CompilerParams(
            dimension_semantics=("arbitrary",)),
    )(*args)


# ----------------------------- parameter setup --------------------------------
def init_params(key):
    def nrm(k, shape, std=0.02):
        return (std * jax.random.normal(k, shape)).astype(jnp.float32)

    keys = iter(jax.random.split(key, 5 + NLAYERS * 6))

    wqkv, wo, wf1, wf2 = [], [], [], []
    for _ in range(NLAYERS):
        wq = nrm(next(keys), (H, H))
        wk = nrm(next(keys), (H, H))
        wv = nrm(next(keys), (H, H))
        wqkv.append(jnp.concatenate([wq, wk, wv], axis=1))   # (H, 3H)
        wo.append(nrm(next(keys), (H, H)))
        wf1.append(nrm(next(keys), (H, FF)))
        wf2.append(nrm(next(keys), (FF, H)))

    params = {
        "word_emb": nrm(next(keys), (VOCAB, H)),
        "pos_emb": nrm(next(keys), (S, H)),
        "type_emb": nrm(next(keys), (2, H)),
        "emb_ln_g": jnp.ones((1, H), jnp.float32),
        "emb_ln_b": jnp.zeros((1, H), jnp.float32),
        # stacked per-layer weights; MXU operands stored as bf16, rest f32
        "wqkv": jnp.stack(wqkv).astype(jnp.bfloat16),          # (L, H, 3H)
        "bqkv": jnp.zeros((NLAYERS, 1, 3 * H), jnp.float32),
        "wo": jnp.stack(wo).astype(jnp.bfloat16),              # (L, H, H)
        "bo": jnp.zeros((NLAYERS, 1, H), jnp.float32),
        "ln1_g": jnp.ones((NLAYERS, 1, H), jnp.float32),
        "ln1_b": jnp.zeros((NLAYERS, 1, H), jnp.float32),
        "wf1": jnp.stack(wf1).astype(jnp.bfloat16),            # (L, H, FF)
        "bf1": jnp.zeros((NLAYERS, 1, FF), jnp.float32),
        "wf2": jnp.stack(wf2).astype(jnp.bfloat16),            # (L, FF, H)
        "bf2": jnp.zeros((NLAYERS, 1, H), jnp.float32),
        "ln2_g": jnp.ones((NLAYERS, 1, H), jnp.float32),
        "ln2_b": jnp.zeros((NLAYERS, 1, H), jnp.float32),
        "pool_w": nrm(next(keys), (H, H)).astype(jnp.bfloat16),
        "pool_b": jnp.zeros((1, H), jnp.float32),
        "out_w": nrm(next(keys), (H, NOUT)),
        "out_b": jnp.zeros((1, NOUT), jnp.float32),
    }
    return params


# ----------------------------- forward pass ------------------------------------
def sentence_pair_classifier_forward(params, input_ids, attn_mask=None):
    if attn_mask is None:
        attn_mask = jnp.ones_like(input_ids)

    # embedding gather (glue, plain JAX); token_type_ids default to 0 as in the
    # PyTorch reference (forward only takes input_ids / attn_mask)
    emb = (params["word_emb"][input_ids]
           + params["pos_emb"][None, :, :]
           + params["type_emb"][0][None, None, :])
    x_flat = emb.reshape(B * S, H).astype(jnp.float32)

    # additive attention-mask bias, precomputed dense (B, S, S)
    bias = jnp.broadcast_to(
        ((1.0 - attn_mask.astype(jnp.float32)) * -1e9)[:, None, :], (B, S, S))

    pooled = fused_encoder_pooler(x_flat, bias, params)        # (B, H)

    # final Linear(H, 1) + squeeze(-1): kept in XLA so the kernel output stays
    # lane-dense (a 1-lane-wide kernel output forces masked partial stores)
    logits = pooled @ params["out_w"] + params["out_b"]        # (B, 1)
    return jnp.squeeze(logits, axis=-1)                        # (B,)


if __name__ == "__main__":
    key = jax.random.PRNGKey(0)
    k_params, k_ids = jax.random.split(key)
    params = init_params(k_params)

    input_ids = jax.random.randint(k_ids, (B, S), 0, VOCAB, dtype=jnp.int32)
    attn_mask = jnp.array([[1, 1, 1, 1, 1, 1, 0, 0],
                           [1, 1, 1, 1, 0, 0, 0, 0]], dtype=jnp.int32)

    fwd = jax.jit(sentence_pair_classifier_forward)
    out = fwd(params, input_ids, attn_mask)
    out = jax.block_until_ready(out)
    assert out.shape == (B,)
    assert bool(jnp.all(jnp.isfinite(out)))
    print("KERNEL_OK")
</pallas_src>

<mosaic_0001>
module attributes {stable_mosaic.version = 11 : i64} {
  func.func @fused_forward_kernel(%arg0: i32, %arg1: memref<16x32xf32, #tpu.memory_space<vmem>>, %arg2: memref<2x8x8xf32, #tpu.memory_space<vmem>>, %arg3: memref<1x32xf32, #tpu.memory_space<vmem>>, %arg4: memref<1x32xf32, #tpu.memory_space<vmem>>, %arg5: memref<2x32x96xbf16, #tpu.memory_space<vmem>>, %arg6: memref<2x1x96xf32, #tpu.memory_space<vmem>>, %arg7: memref<2x32x32xbf16, #tpu.memory_space<vmem>>, %arg8: memref<2x1x32xf32, #tpu.memory_space<vmem>>, %arg9: memref<2x1x32xf32, #tpu.memory_space<vmem>>, %arg10: memref<2x1x32xf32, #tpu.memory_space<vmem>>, %arg11: memref<2x32x64xbf16, #tpu.memory_space<vmem>>, %arg12: memref<2x1x64xf32, #tpu.memory_space<vmem>>, %arg13: memref<2x64x32xbf16, #tpu.memory_space<vmem>>, %arg14: memref<2x1x32xf32, #tpu.memory_space<vmem>>, %arg15: memref<2x1x32xf32, #tpu.memory_space<vmem>>, %arg16: memref<2x1x32xf32, #tpu.memory_space<vmem>>, %arg17: memref<32x32xbf16, #tpu.memory_space<vmem>>, %arg18: memref<1x32xf32, #tpu.memory_space<vmem>>, %arg19: memref<2x32xf32, #tpu.memory_space<vmem>>) attributes {dimension_semantics = [#tpu.dimension_semantics<arbitrary>], iteration_bounds = array<i64: 1>, scalar_prefetch = 0 : i64, scratch_operands = 0 : i64, tpu.core_type = #tpu.core_type<tc>, window_params = [{pipeline_mode = #tpu.pipeline_mode<synchronous>, transform_indices = @transform_0, window_bounds = array<i64: 16, 32>}, {pipeline_mode = #tpu.pipeline_mode<synchronous>, transform_indices = @transform_1, window_bounds = array<i64: 2, 8, 8>}, {pipeline_mode = #tpu.pipeline_mode<synchronous>, transform_indices = @transform_2, window_bounds = array<i64: 1, 32>}, {pipeline_mode = #tpu.pipeline_mode<synchronous>, transform_indices = @transform_3, window_bounds = array<i64: 1, 32>}, {pipeline_mode = #tpu.pipeline_mode<synchronous>, transform_indices = @transform_4, window_bounds = array<i64: 2, 32, 96>}, {pipeline_mode = #tpu.pipeline_mode<synchronous>, transform_indices = @transform_5, window_bounds = array<i64: 2, 1, 96>}, {pipeline_mode = #tpu.pipeline_mode<synchronous>, transform_indices = @transform_6, window_bounds = array<i64: 2, 32, 32>}, {pipeline_mode = #tpu.pipeline_mode<synchronous>, transform_indices = @transform_7, window_bounds = array<i64: 2, 1, 32>}, {pipeline_mode = #tpu.pipeline_mode<synchronous>, transform_indices = @transform_8, window_bounds = array<i64: 2, 1, 32>}, {pipeline_mode = #tpu.pipeline_mode<synchronous>, transform_indices = @transform_9, window_bounds = array<i64: 2, 1, 32>}, {pipeline_mode = #tpu.pipeline_mode<synchronous>, transform_indices = @transform_10, window_bounds = array<i64: 2, 32, 64>}, {pipeline_mode = #tpu.pipeline_mode<synchronous>, transform_indices = @transform_11, window_bounds = array<i64: 2, 1, 64>}, {pipeline_mode = #tpu.pipeline_mode<synchronous>, transform_indices = @transform_12, window_bounds = array<i64: 2, 64, 32>}, {pipeline_mode = #tpu.pipeline_mode<synchronous>, transform_indices = @transform_13, window_bounds = array<i64: 2, 1, 32>}, {pipeline_mode = #tpu.pipeline_mode<synchronous>, transform_indices = @transform_14, window_bounds = array<i64: 2, 1, 32>}, {pipeline_mode = #tpu.pipeline_mode<synchronous>, transform_indices = @transform_15, window_bounds = array<i64: 2, 1, 32>}, {pipeline_mode = #tpu.pipeline_mode<synchronous>, transform_indices = @transform_16, window_bounds = array<i64: 32, 32>}, {pipeline_mode = #tpu.pipeline_mode<synchronous>, transform_indices = @transform_17, window_bounds = array<i64: 1, 32>}, {pipeline_mode = #tpu.pipeline_mode<synchronous>, transform_indices = @transform_18, window_bounds = array<i64: 2, 32>}]} {
    %c0 = arith.constant 0 : index
    %c0_0 = arith.constant 0 : index
    %0 = vector.load %arg1[%c0, %c0_0] : memref<16x32xf32, #tpu.memory_space<vmem>>, vector<16x32xf32>
    %c0_1 = arith.constant 0 : index
    %c0_2 = arith.constant 0 : index
    %1 = vector.load %arg3[%c0_1, %c0_2] : memref<1x32xf32, #tpu.memory_space<vmem>>, vector<1x32xf32>
    %c0_3 = arith.constant 0 : index
    %c0_4 = arith.constant 0 : index
    %2 = vector.load %arg4[%c0_3, %c0_4] : memref<1x32xf32, #tpu.memory_space<vmem>>, vector<1x32xf32>
    %cst = arith.constant dense<0.000000e+00> : vector<16xf32>
    %3 = vector.multi_reduction <add>, %0, %cst [1] : vector<16x32xf32> to vector<16xf32>
    %4 = vector.shape_cast %3 : vector<16xf32> to vector<16x1xf32>
    %cst_5 = arith.constant 3.200000e+01 : f32
    %5 = vector.broadcast %cst_5 : f32 to vector<16x1xf32>
    %6 = arith.divf %4, %5 : vector<16x1xf32>
    %7 = vector.broadcast %6 : vector<16x1xf32> to vector<16x32xf32>
    %8 = arith.subf %0, %7 : vector<16x32xf32>
    %9 = arith.mulf %8, %8 : vector<16x32xf32>
    %cst_6 = arith.constant dense<0.000000e+00> : vector<16xf32>
    %10 = vector.multi_reduction <add>, %9, %cst_6 [1] : vector<16x32xf32> to vector<16xf32>
    %11 = vector.shape_cast %10 : vector<16xf32> to vector<16x1xf32>
    %cst_7 = arith.constant 3.200000e+01 : f32
    %12 = vector.broadcast %cst_7 : f32 to vector<16x1xf32>
    %13 = arith.divf %11, %12 : vector<16x1xf32>
    %14 = vector.broadcast %6 : vector<16x1xf32> to vector<16x32xf32>
    %15 = arith.subf %0, %14 : vector<16x32xf32>
    %cst_8 = arith.constant 9.99999996E-13 : f32
    %16 = vector.broadcast %cst_8 : f32 to vector<16x1xf32>
    %17 = arith.addf %13, %16 : vector<16x1xf32>
    %18 = math.rsqrt %17 : vector<16x1xf32>
    %19 = vector.broadcast %18 : vector<16x1xf32> to vector<16x32xf32>
    %20 = arith.mulf %15, %19 : vector<16x32xf32>
    %21 = vector.broadcast %1 : vector<1x32xf32> to vector<16x32xf32>
    %22 = arith.mulf %20, %21 : vector<16x32xf32>
    %23 = vector.broadcast %2 : vector<1x32xf32> to vector<16x32xf32>
    %24 = arith.addf %22, %23 : vector<16x32xf32>
    %c0_9 = arith.constant 0 : index
    %c0_10 = arith.constant 0 : index
    %c0_11 = arith.constant 0 : index
    %25 = vector.load %arg2[%c0_9, %c0_10, %c0_11] : memref<2x8x8xf32, #tpu.memory_space<vmem>>, vector<2x8x8xf32>
    %c0_12 = arith.constant 0 : index
    %c0_13 = arith.constant 0 : index
    %c0_14 = arith.constant 0 : index
    %26 = vector.load %arg5[%c0_12, %c0_13, %c0_14] : memref<2x32x96xbf16, #tpu.memory_space<vmem>>, vector<1x32x96xbf16>
    %27 = vector.shape_cast %26 : vector<1x32x96xbf16> to vector<32x96xbf16>
    %c0_15 = arith.constant 0 : index
    %c0_16 = arith.constant 0 : index
    %c0_17 = arith.constant 0 : index
    %28 = vector.load %arg7[%c0_15, %c0_16, %c0_17] : memref<2x32x32xbf16, #tpu.memory_space<vmem>>, vector<1x32x32xbf16>
    %29 = vector.shape_cast %28 : vector<1x32x32xbf16> to vector<32x32xbf16>
    %30 = arith.truncf %24 : vector<16x32xf32> to vector<16x32xbf16>
    %cst_18 = arith.constant dense<0.000000e+00> : vector<16x96xf32>
    %31 = tpu.matmul %30, %27, %cst_18 {dimension_numbers = #tpu.dot_dimension_numbers<[1], [0], [0], [1], [0, 0, 1, 1], [], []>} : vector<16x32xbf16>, vector<32x96xbf16>, vector<16x96xf32> -> vector<16x96xf32>
    %c0_19 = arith.constant 0 : index
    %c0_20 = arith.constant 0 : index
    %c0_21 = arith.constant 0 : index
    %32 = vector.load %arg6[%c0_19, %c0_20, %c0_21] : memref<2x1x96xf32, #tpu.memory_space<vmem>>, vector<1x1x96xf32>
    %33 = vector.shape_cast %32 : vector<1x1x96xf32> to vector<1x96xf32>
    %34 = vector.broadcast %33 : vector<1x96xf32> to vector<16x96xf32>
    %35 = arith.addf %31, %34 : vector<16x96xf32>
    %cst_22 = arith.constant 0.000000e+00 : f32
    %36 = vector.broadcast %cst_22 : f32 to vector<16x32xf32>
    %37 = vector.extract_strided_slice %35 {offsets = [0, 0], sizes = [16, 8], strides = [1, 1]} : vector<16x96xf32> to vector<16x8xf32>
    %38 = vector.shape_cast %37 : vector<16x8xf32> to vector<2x8x8xf32>
    %39 = vector.extract_strided_slice %35 {offsets = [0, 32], sizes = [16, 8], strides = [1, 1]} : vector<16x96xf32> to vector<16x8xf32>
    %40 = vector.shape_cast %39 : vector<16x8xf32> to vector<2x8x8xf32>
    %41 = vector.extract_strided_slice %35 {offsets = [0, 64], sizes = [16, 8], strides = [1, 1]} : vector<16x96xf32> to vector<16x8xf32>
    %42 = vector.shape_cast %41 : vector<16x8xf32> to vector<2x8x8xf32>
    %43 = arith.truncf %38 : vector<2x8x8xf32> to vector<2x8x8xbf16>
    %44 = arith.truncf %40 : vector<2x8x8xf32> to vector<2x8x8xbf16>
    "tpu.trace_start"() <{level = 10 : i32, message = "bqd,bkd->bqk"}> : () -> ()
    %cst_23 = arith.constant dense<0.000000e+00> : vector<2x8x8xf32>
    %45 = tpu.matmul %43, %44, %cst_23 {dimension_numbers = #tpu.dot_dimension_numbers<[2], [2], [1], [1], [0, 0, 0, 1, 1, 1], [0], [0]>} : vector<2x8x8xbf16>, vector<2x8x8xbf16>, vector<2x8x8xf32> -> vector<2x8x8xf32>
    "tpu.trace_stop"() : () -> ()
    %cst_24 = arith.constant 0.353553385 : f32
    %46 = vector.broadcast %cst_24 : f32 to vector<2x8x8xf32>
    %47 = arith.mulf %45, %46 : vector<2x8x8xf32>
    %48 = arith.addf %47, %25 : vector<2x8x8xf32>
    %cst_25 = arith.constant dense<0xFF800000> : vector<2x8xf32>
    %49 = vector.multi_reduction <maximumf>, %48, %cst_25 [2] : vector<2x8x8xf32> to vector<2x8xf32>
    %50 = vector.shape_cast %49 : vector<2x8xf32> to vector<2x8x1xf32>
    %51 = vector.broadcast %50 : vector<2x8x1xf32> to vector<2x8x8xf32>
    %52 = arith.subf %48, %51 : vector<2x8x8xf32>
    %53 = math.exp %52 : vector<2x8x8xf32>
    %cst_26 = arith.constant dense<0.000000e+00> : vector<2x8xf32>
    %54 = vector.multi_reduction <add>, %53, %cst_26 [2] : vector<2x8x8xf32> to vector<2x8xf32>
    %55 = vector.shape_cast %54 : vector<2x8xf32> to vector<2x8x1xf32>
    %56 = tpu.reciprocal %55 {approx = true} : vector<2x8x1xf32> -> vector<2x8x1xf32>
    %57 = vector.broadcast %56 : vector<2x8x1xf32> to vector<2x8x8xf32>
    %58 = arith.mulf %53, %57 : vector<2x8x8xf32>
    %59 = arith.truncf %58 : vector<2x8x8xf32> to vector<2x8x8xbf16>
    %60 = arith.truncf %42 : vector<2x8x8xf32> to vector<2x8x8xbf16>
    "tpu.trace_start"() <{level = 10 : i32, message = "bqk,bkd->bqd"}> : () -> ()
    %cst_27 = arith.constant dense<0.000000e+00> : vector<2x8x8xf32>
    %61 = tpu.matmul %59, %60, %cst_27 {dimension_numbers = #tpu.dot_dimension_numbers<[2], [1], [1], [2], [0, 0, 0, 1, 1, 2], [0], [0]>} : vector<2x8x8xbf16>, vector<2x8x8xbf16>, vector<2x8x8xf32> -> vector<2x8x8xf32>
    "tpu.trace_stop"() : () -> ()
    %62 = vector.shape_cast %61 : vector<2x8x8xf32> to vector<16x8xf32>
    %63 = arith.truncf %62 : vector<16x8xf32> to vector<16x8xbf16>
    %64 = vector.extract_strided_slice %29 {offsets = [0, 0], sizes = [8, 32], strides = [1, 1]} : vector<32x32xbf16> to vector<8x32xbf16>
    %cst_28 = arith.constant dense<0.000000e+00> : vector<16x32xf32>
    %65 = tpu.matmul %63, %64, %cst_28 {dimension_numbers = #tpu.dot_dimension_numbers<[1], [0], [0], [1], [0, 0, 1, 1], [], []>} : vector<16x8xbf16>, vector<8x32xbf16>, vector<16x32xf32> -> vector<16x32xf32>
    %66 = arith.addf %36, %65 : vector<16x32xf32>
    %67 = vector.extract_strided_slice %35 {offsets = [0, 8], sizes = [16, 8], strides = [1, 1]} : vector<16x96xf32> to vector<16x8xf32>
    %68 = vector.shape_cast %67 : vector<16x8xf32> to vector<2x8x8xf32>
    %69 = vector.extract_strided_slice %35 {offsets = [0, 40], sizes = [16, 8], strides = [1, 1]} : vector<16x96xf32> to vector<16x8xf32>
    %70 = vector.shape_cast %69 : vector<16x8xf32> to vector<2x8x8xf32>
    %71 = vector.extract_strided_slice %35 {offsets = [0, 72], sizes = [16, 8], strides = [1, 1]} : vector<16x96xf32> to vector<16x8xf32>
    %72 = vector.shape_cast %71 : vector<16x8xf32> to vector<2x8x8xf32>
    %73 = arith.truncf %68 : vector<2x8x8xf32> to vector<2x8x8xbf16>
    %74 = arith.truncf %70 : vector<2x8x8xf32> to vector<2x8x8xbf16>
    "tpu.trace_start"() <{level = 10 : i32, message = "bqd,bkd->bqk"}> : () -> ()
    %cst_29 = arith.constant dense<0.000000e+00> : vector<2x8x8xf32>
    %75 = tpu.matmul %73, %74, %cst_29 {dimension_numbers = #tpu.dot_dimension_numbers<[2], [2], [1], [1], [0, 0, 0, 1, 1, 1], [0], [0]>} : vector<2x8x8xbf16>, vector<2x8x8xbf16>, vector<2x8x8xf32> -> vector<2x8x8xf32>
    "tpu.trace_stop"() : () -> ()
    %cst_30 = arith.constant 0.353553385 : f32
    %76 = vector.broadcast %cst_30 : f32 to vector<2x8x8xf32>
    %77 = arith.mulf %75, %76 : vector<2x8x8xf32>
    %78 = arith.addf %77, %25 : vector<2x8x8xf32>
    %cst_31 = arith.constant dense<0xFF800000> : vector<2x8xf32>
    %79 = vector.multi_reduction <maximumf>, %78, %cst_31 [2] : vector<2x8x8xf32> to vector<2x8xf32>
    %80 = vector.shape_cast %79 : vector<2x8xf32> to vector<2x8x1xf32>
    %81 = vector.broadcast %80 : vector<2x8x1xf32> to vector<2x8x8xf32>
    %82 = arith.subf %78, %81 : vector<2x8x8xf32>
    %83 = math.exp %82 : vector<2x8x8xf32>
    %cst_32 = arith.constant dense<0.000000e+00> : vector<2x8xf32>
    %84 = vector.multi_reduction <add>, %83, %cst_32 [2] : vector<2x8x8xf32> to vector<2x8xf32>
    %85 = vector.shape_cast %84 : vector<2x8xf32> to vector<2x8x1xf32>
    %86 = tpu.reciprocal %85 {approx = true} : vector<2x8x1xf32> -> vector<2x8x1xf32>
    %87 = vector.broadcast %86 : vector<2x8x1xf32> to vector<2x8x8xf32>
    %88 = arith.mulf %83, %87 : vector<2x8x8xf32>
    %89 = arith.truncf %88 : vector<2x8x8xf32> to vector<2x8x8xbf16>
    %90 = arith.truncf %72 : vector<2x8x8xf32> to vector<2x8x8xbf16>
    "tpu.trace_start"() <{level = 10 : i32, message = "bqk,bkd->bqd"}> : () -> ()
    %cst_33 = arith.constant dense<0.000000e+00> : vector<2x8x8xf32>
    %91 = tpu.matmul %89, %90, %cst_33 {dimension_numbers = #tpu.dot_dimension_numbers<[2], [1], [1], [2], [0, 0, 0, 1, 1, 2], [0], [0]>} : vector<2x8x8xbf16>, vector<2x8x8xbf16>, vector<2x8x8xf32> -> vector<2x8x8xf32>
    "tpu.trace_stop"() : () -> ()
    %92 = vector.shape_cast %91 : vector<2x8x8xf32> to vector<16x8xf32>
    %93 = arith.truncf %92 : vector<16x8xf32> to vector<16x8xbf16>
    %94 = vector.extract_strided_slice %29 {offsets = [8, 0], sizes = [8, 32], strides = [1, 1]} : vector<32x32xbf16> to vector<8x32xbf16>
    %cst_34 = arith.constant dense<0.000000e+00> : vector<16x32xf32>
    %95 = tpu.matmul %93, %94, %cst_34 {dimension_numbers = #tpu.dot_dimension_numbers<[1], [0], [0], [1], [0, 0, 1, 1], [], []>} : vector<16x8xbf16>, vector<8x32xbf16>, vector<16x32xf32> -> vector<16x32xf32>
    %96 = arith.addf %66, %95 : vector<16x32xf32>
    %97 = vector.extract_strided_slice %35 {offsets = [0, 16], sizes = [16, 8], strides = [1, 1]} : vector<16x96xf32> to vector<16x8xf32>
    %98 = vector.shape_cast %97 : vector<16x8xf32> to vector<2x8x8xf32>
    %99 = vector.extract_strided_slice %35 {offsets = [0, 48], sizes = [16, 8], strides = [1, 1]} : vector<16x96xf32> to vector<16x8xf32>
    %100 = vector.shape_cast %99 : vector<16x8xf32> to vector<2x8x8xf32>
    %101 = vector.extract_strided_slice %35 {offsets = [0, 80], sizes = [16, 8], strides = [1, 1]} : vector<16x96xf32> to vector<16x8xf32>
    %102 = vector.shape_cast %101 : vector<16x8xf32> to vector<2x8x8xf32>
    %103 = arith.truncf %98 : vector<2x8x8xf32> to vector<2x8x8xbf16>
    %104 = arith.truncf %100 : vector<2x8x8xf32> to vector<2x8x8xbf16>
    "tpu.trace_start"() <{level = 10 : i32, message = "bqd,bkd->bqk"}> : () -> ()
    %cst_35 = arith.constant dense<0.000000e+00> : vector<2x8x8xf32>
    %105 = tpu.matmul %103, %104, %cst_35 {dimension_numbers = #tpu.dot_dimension_numbers<[2], [2], [1], [1], [0, 0, 0, 1, 1, 1], [0], [0]>} : vector<2x8x8xbf16>, vector<2x8x8xbf16>, vector<2x8x8xf32> -> vector<2x8x8xf32>
    "tpu.trace_stop"() : () -> ()
    %cst_36 = arith.constant 0.353553385 : f32
    %106 = vector.broadcast %cst_36 : f32 to vector<2x8x8xf32>
    %107 = arith.mulf %105, %106 : vector<2x8x8xf32>
    %108 = arith.addf %107, %25 : vector<2x8x8xf32>
    %cst_37 = arith.constant dense<0xFF800000> : vector<2x8xf32>
    %109 = vector.multi_reduction <maximumf>, %108, %cst_37 [2] : vector<2x8x8xf32> to vector<2x8xf32>
    %110 = vector.shape_cast %109 : vector<2x8xf32> to vector<2x8x1xf32>
    %111 = vector.broadcast %110 : vector<2x8x1xf32> to vector<2x8x8xf32>
    %112 = arith.subf %108, %111 : vector<2x8x8xf32>
    %113 = math.exp %112 : vector<2x8x8xf32>
    %cst_38 = arith.constant dense<0.000000e+00> : vector<2x8xf32>
    %114 = vector.multi_reduction <add>, %113, %cst_38 [2] : vector<2x8x8xf32> to vector<2x8xf32>
    %115 = vector.shape_cast %114 : vector<2x8xf32> to vector<2x8x1xf32>
    %116 = tpu.reciprocal %115 {approx = true} : vector<2x8x1xf32> -> vector<2x8x1xf32>
    %117 = vector.broadcast %116 : vector<2x8x1xf32> to vector<2x8x8xf32>
    %118 = arith.mulf %113, %117 : vector<2x8x8xf32>
    %119 = arith.truncf %118 : vector<2x8x8xf32> to vector<2x8x8xbf16>
    %120 = arith.truncf %102 : vector<2x8x8xf32> to vector<2x8x8xbf16>
    "tpu.trace_start"() <{level = 10 : i32, message = "bqk,bkd->bqd"}> : () -> ()
    %cst_39 = arith.constant dense<0.000000e+00> : vector<2x8x8xf32>
    %121 = tpu.matmul %119, %120, %cst_39 {dimension_numbers = #tpu.dot_dimension_numbers<[2], [1], [1], [2], [0, 0, 0, 1, 1, 2], [0], [0]>} : vector<2x8x8xbf16>, vector<2x8x8xbf16>, vector<2x8x8xf32> -> vector<2x8x8xf32>
    "tpu.trace_stop"() : () -> ()
    %122 = vector.shape_cast %121 : vector<2x8x8xf32> to vector<16x8xf32>
    %123 = arith.truncf %122 : vector<16x8xf32> to vector<16x8xbf16>
    %124 = vector.extract_strided_slice %29 {offsets = [16, 0], sizes = [8, 32], strides = [1, 1]} : vector<32x32xbf16> to vector<8x32xbf16>
    %cst_40 = arith.constant dense<0.000000e+00> : vector<16x32xf32>
    %125 = tpu.matmul %123, %124, %cst_40 {dimension_numbers = #tpu.dot_dimension_numbers<[1], [0], [0], [1], [0, 0, 1, 1], [], []>} : vector<16x8xbf16>, vector<8x32xbf16>, vector<16x32xf32> -> vector<16x32xf32>
    %126 = arith.addf %96, %125 : vector<16x32xf32>
    %127 = vector.extract_strided_slice %35 {offsets = [0, 24], sizes = [16, 8], strides = [1, 1]} : vector<16x96xf32> to vector<16x8xf32>
    %128 = vector.shape_cast %127 : vector<16x8xf32> to vector<2x8x8xf32>
    %129 = vector.extract_strided_slice %35 {offsets = [0, 56], sizes = [16, 8], strides = [1, 1]} : vector<16x96xf32> to vector<16x8xf32>
    %130 = vector.shape_cast %129 : vector<16x8xf32> to vector<2x8x8xf32>
    %131 = vector.extract_strided_slice %35 {offsets = [0, 88], sizes = [16, 8], strides = [1, 1]} : vector<16x96xf32> to vector<16x8xf32>
    %132 = vector.shape_cast %131 : vector<16x8xf32> to vector<2x8x8xf32>
    %133 = arith.truncf %128 : vector<2x8x8xf32> to vector<2x8x8xbf16>
    %134 = arith.truncf %130 : vector<2x8x8xf32> to vector<2x8x8xbf16>
    "tpu.trace_start"() <{level = 10 : i32, message = "bqd,bkd->bqk"}> : () -> ()
    %cst_41 = arith.constant dense<0.000000e+00> : vector<2x8x8xf32>
    %135 = tpu.matmul %133, %134, %cst_41 {dimension_numbers = #tpu.dot_dimension_numbers<[2], [2], [1], [1], [0, 0, 0, 1, 1, 1], [0], [0]>} : vector<2x8x8xbf16>, vector<2x8x8xbf16>, vector<2x8x8xf32> -> vector<2x8x8xf32>
    "tpu.trace_stop"() : () -> ()
    %cst_42 = arith.constant 0.353553385 : f32
    %136 = vector.broadcast %cst_42 : f32 to vector<2x8x8xf32>
    %137 = arith.mulf %135, %136 : vector<2x8x8xf32>
    %138 = arith.addf %137, %25 : vector<2x8x8xf32>
    %cst_43 = arith.constant dense<0xFF800000> : vector<2x8xf32>
    %139 = vector.multi_reduction <maximumf>, %138, %cst_43 [2] : vector<2x8x8xf32> to vector<2x8xf32>
    %140 = vector.shape_cast %139 : vector<2x8xf32> to vector<2x8x1xf32>
    %141 = vector.broadcast %140 : vector<2x8x1xf32> to vector<2x8x8xf32>
    %142 = arith.subf %138, %141 : vector<2x8x8xf32>
    %143 = math.exp %142 : vector<2x8x8xf32>
    %cst_44 = arith.constant dense<0.000000e+00> : vector<2x8xf32>
    %144 = vector.multi_reduction <add>, %143, %cst_44 [2] : vector<2x8x8xf32> to vector<2x8xf32>
    %145 = vector.shape_cast %144 : vector<2x8xf32> to vector<2x8x1xf32>
    %146 = tpu.reciprocal %145 {approx = true} : vector<2x8x1xf32> -> vector<2x8x1xf32>
    %147 = vector.broadcast %146 : vector<2x8x1xf32> to vector<2x8x8xf32>
    %148 = arith.mulf %143, %147 : vector<2x8x8xf32>
    %149 = arith.truncf %148 : vector<2x8x8xf32> to vector<2x8x8xbf16>
    %150 = arith.truncf %132 : vector<2x8x8xf32> to vector<2x8x8xbf16>
    "tpu.trace_start"() <{level = 10 : i32, message = "bqk,bkd->bqd"}> : () -> ()
    %cst_45 = arith.constant dense<0.000000e+00> : vector<2x8x8xf32>
    %151 = tpu.matmul %149, %150, %cst_45 {dimension_numbers = #tpu.dot_dimension_numbers<[2], [1], [1], [2], [0, 0, 0, 1, 1, 2], [0], [0]>} : vector<2x8x8xbf16>, vector<2x8x8xbf16>, vector<2x8x8xf32> -> vector<2x8x8xf32>
    "tpu.trace_stop"() : () -> ()
    %152 = vector.shape_cast %151 : vector<2x8x8xf32> to vector<16x8xf32>
    %153 = arith.truncf %152 : vector<16x8xf32> to vector<16x8xbf16>
    %154 = vector.extract_strided_slice %29 {offsets = [24, 0], sizes = [8, 32], strides = [1, 1]} : vector<32x32xbf16> to vector<8x32xbf16>
    %cst_46 = arith.constant dense<0.000000e+00> : vector<16x32xf32>
    %155 = tpu.matmul %153, %154, %cst_46 {dimension_numbers = #tpu.dot_dimension_numbers<[1], [0], [0], [1], [0, 0, 1, 1], [], []>} : vector<16x8xbf16>, vector<8x32xbf16>, vector<16x32xf32> -> vector<16x32xf32>
    %156 = arith.addf %126, %155 : vector<16x32xf32>
    %c0_47 = arith.constant 0 : index
    %c0_48 = arith.constant 0 : index
    %c0_49 = arith.constant 0 : index
    %157 = vector.load %arg8[%c0_47, %c0_48, %c0_49] : memref<2x1x32xf32, #tpu.memory_space<vmem>>, vector<1x1x32xf32>
    %158 = vector.shape_cast %157 : vector<1x1x32xf32> to vector<1x32xf32>
    %159 = vector.broadcast %158 : vector<1x32xf32> to vector<16x32xf32>
    %160 = arith.addf %156, %159 : vector<16x32xf32>
    %161 = arith.addf %24, %160 : vector<16x32xf32>
    %c0_50 = arith.constant 0 : index
    %c0_51 = arith.constant 0 : index
    %c0_52 = arith.constant 0 : index
    %162 = vector.load %arg9[%c0_50, %c0_51, %c0_52] : memref<2x1x32xf32, #tpu.memory_space<vmem>>, vector<1x1x32xf32>
    %163 = vector.shape_cast %162 : vector<1x1x32xf32> to vector<1x32xf32>
    %c0_53 = arith.constant 0 : index
    %c0_54 = arith.constant 0 : index
    %c0_55 = arith.constant 0 : index
    %164 = vector.load %arg10[%c0_53, %c0_54, %c0_55] : memref<2x1x32xf32, #tpu.memory_space<vmem>>, vector<1x1x32xf32>
    %165 = vector.shape_cast %164 : vector<1x1x32xf32> to vector<1x32xf32>
    %cst_56 = arith.constant dense<0.000000e+00> : vector<16xf32>
    %166 = vector.multi_reduction <add>, %161, %cst_56 [1] : vector<16x32xf32> to vector<16xf32>
    %167 = vector.shape_cast %166 : vector<16xf32> to vector<16x1xf32>
    %cst_57 = arith.constant 3.200000e+01 : f32
    %168 = vector.broadcast %cst_57 : f32 to vector<16x1xf32>
    %169 = arith.divf %167, %168 : vector<16x1xf32>
    %170 = vector.broadcast %169 : vector<16x1xf32> to vector<16x32xf32>
    %171 = arith.subf %161, %170 : vector<16x32xf32>
    %172 = arith.mulf %171, %171 : vector<16x32xf32>
    %cst_58 = arith.constant dense<0.000000e+00> : vector<16xf32>
    %173 = vector.multi_reduction <add>, %172, %cst_58 [1] : vector<16x32xf32> to vector<16xf32>
    %174 = vector.shape_cast %173 : vector<16xf32> to vector<16x1xf32>
    %cst_59 = arith.constant 3.200000e+01 : f32
    %175 = vector.broadcast %cst_59 : f32 to vector<16x1xf32>
    %176 = arith.divf %174, %175 : vector<16x1xf32>
    %177 = vector.broadcast %169 : vector<16x1xf32> to vector<16x32xf32>
    %178 = arith.subf %161, %177 : vector<16x32xf32>
    %cst_60 = arith.constant 9.99999996E-13 : f32
    %179 = vector.broadcast %cst_60 : f32 to vector<16x1xf32>
    %180 = arith.addf %176, %179 : vector<16x1xf32>
    %181 = math.rsqrt %180 : vector<16x1xf32>
    %182 = vector.broadcast %181 : vector<16x1xf32> to vector<16x32xf32>
    %183 = arith.mulf %178, %182 : vector<16x32xf32>
    %184 = vector.broadcast %163 : vector<1x32xf32> to vector<16x32xf32>
    %185 = arith.mulf %183, %184 : vector<16x32xf32>
    %186 = vector.broadcast %165 : vector<1x32xf32> to vector<16x32xf32>
    %187 = arith.addf %185, %186 : vector<16x32xf32>
    %188 = arith.truncf %187 : vector<16x32xf32> to vector<16x32xbf16>
    %c0_61 = arith.constant 0 : index
    %c0_62 = arith.constant 0 : index
    %c0_63 = arith.constant 0 : index
    %189 = vector.load %arg11[%c0_61, %c0_62, %c0_63] : memref<2x32x64xbf16, #tpu.memory_space<vmem>>, vector<1x32x64xbf16>
    %190 = vector.shape_cast %189 : vector<1x32x64xbf16> to vector<32x64xbf16>
    %cst_64 = arith.constant dense<0.000000e+00> : vector<16x64xf32>
    %191 = tpu.matmul %188, %190, %cst_64 {dimension_numbers = #tpu.dot_dimension_numbers<[1], [0], [0], [1], [0, 0, 1, 1], [], []>} : vector<16x32xbf16>, vector<32x64xbf16>, vector<16x64xf32> -> vector<16x64xf32>
    %c0_65 = arith.constant 0 : index
    %c0_66 = arith.constant 0 : index
    %c0_67 = arith.constant 0 : index
    %192 = vector.load %arg12[%c0_65, %c0_66, %c0_67] : memref<2x1x64xf32, #tpu.memory_space<vmem>>, vector<1x1x64xf32>
    %193 = vector.shape_cast %192 : vector<1x1x64xf32> to vector<1x64xf32>
    %194 = vector.broadcast %193 : vector<1x64xf32> to vector<16x64xf32>
    %195 = arith.addf %191, %194 : vector<16x64xf32>
    %196 = arith.mulf %195, %195 : vector<16x64xf32>
    %197 = arith.mulf %195, %196 : vector<16x64xf32>
    %cst_68 = arith.constant 4.471500e-02 : f32
    %198 = vector.broadcast %cst_68 : f32 to vector<16x64xf32>
    %199 = arith.mulf %198, %197 : vector<16x64xf32>
    %200 = arith.addf %195, %199 : vector<16x64xf32>
    %cst_69 = arith.constant 0.797884583 : f32
    %201 = vector.broadcast %cst_69 : f32 to vector<16x64xf32>
    %202 = arith.mulf %201, %200 : vector<16x64xf32>
    %203 = math.tanh %202 : vector<16x64xf32>
    %cst_70 = arith.constant 1.000000e+00 : f32
    %204 = vector.broadcast %cst_70 : f32 to vector<16x64xf32>
    %205 = arith.addf %204, %203 : vector<16x64xf32>
    %cst_71 = arith.constant 5.000000e-01 : f32
    %206 = vector.broadcast %cst_71 : f32 to vector<16x64xf32>
    %207 = arith.mulf %206, %205 : vector<16x64xf32>
    %208 = arith.mulf %195, %207 : vector<16x64xf32>
    %209 = arith.truncf %208 : vector<16x64xf32> to vector<16x64xbf16>
    %c0_72 = arith.constant 0 : index
    %c0_73 = arith.constant 0 : index
    %c0_74 = arith.constant 0 : index
    %210 = vector.load %arg13[%c0_72, %c0_73, %c0_74] : memref<2x64x32xbf16, #tpu.memory_space<vmem>>, vector<1x64x32xbf16>
    %211 = vector.shape_cast %210 : vector<1x64x32xbf16> to vector<64x32xbf16>
    %cst_75 = arith.constant dense<0.000000e+00> : vector<16x32xf32>
    %212 = tpu.matmul %209, %211, %cst_75 {dimension_numbers = #tpu.dot_dimension_numbers<[1], [0], [0], [1], [0, 0, 1, 1], [], []>} : vector<16x64xbf16>, vector<64x32xbf16>, vector<16x32xf32> -> vector<16x32xf32>
    %c0_76 = arith.constant 0 : index
    %c0_77 = arith.constant 0 : index
    %c0_78 = arith.constant 0 : index
    %213 = vector.load %arg14[%c0_76, %c0_77, %c0_78] : memref<2x1x32xf32, #tpu.memory_space<vmem>>, vector<1x1x32xf32>
    %214 = vector.shape_cast %213 : vector<1x1x32xf32> to vector<1x32xf32>
    %215 = vector.broadcast %214 : vector<1x32xf32> to vector<16x32xf32>
    %216 = arith.addf %212, %215 : vector<16x32xf32>
    %217 = arith.addf %187, %216 : vector<16x32xf32>
    %c0_79 = arith.constant 0 : index
    %c0_80 = arith.constant 0 : index
    %c0_81 = arith.constant 0 : index
    %218 = vector.load %arg15[%c0_79, %c0_80, %c0_81] : memref<2x1x32xf32, #tpu.memory_space<vmem>>, vector<1x1x32xf32>
    %219 = vector.shape_cast %218 : vector<1x1x32xf32> to vector<1x32xf32>
    %c0_82 = arith.constant 0 : index
    %c0_83 = arith.constant 0 : index
    %c0_84 = arith.constant 0 : index
    %220 = vector.load %arg16[%c0_82, %c0_83, %c0_84] : memref<2x1x32xf32, #tpu.memory_space<vmem>>, vector<1x1x32xf32>
    %221 = vector.shape_cast %220 : vector<1x1x32xf32> to vector<1x32xf32>
    %cst_85 = arith.constant dense<0.000000e+00> : vector<16xf32>
    %222 = vector.multi_reduction <add>, %217, %cst_85 [1] : vector<16x32xf32> to vector<16xf32>
    %223 = vector.shape_cast %222 : vector<16xf32> to vector<16x1xf32>
    %cst_86 = arith.constant 3.200000e+01 : f32
    %224 = vector.broadcast %cst_86 : f32 to vector<16x1xf32>
    %225 = arith.divf %223, %224 : vector<16x1xf32>
    %226 = vector.broadcast %225 : vector<16x1xf32> to vector<16x32xf32>
    %227 = arith.subf %217, %226 : vector<16x32xf32>
    %228 = arith.mulf %227, %227 : vector<16x32xf32>
    %cst_87 = arith.constant dense<0.000000e+00> : vector<16xf32>
    %229 = vector.multi_reduction <add>, %228, %cst_87 [1] : vector<16x32xf32> to vector<16xf32>
    %230 = vector.shape_cast %229 : vector<16xf32> to vector<16x1xf32>
    %cst_88 = arith.constant 3.200000e+01 : f32
    %231 = vector.broadcast %cst_88 : f32 to vector<16x1xf32>
    %232 = arith.divf %230, %231 : vector<16x1xf32>
    %233 = vector.broadcast %225 : vector<16x1xf32> to vector<16x32xf32>
    %234 = arith.subf %217, %233 : vector<16x32xf32>
    %cst_89 = arith.constant 9.99999996E-13 : f32
    %235 = vector.broadcast %cst_89 : f32 to vector<16x1xf32>
    %236 = arith.addf %232, %235 : vector<16x1xf32>
    %237 = math.rsqrt %236 : vector<16x1xf32>
    %238 = vector.broadcast %237 : vector<16x1xf32> to vector<16x32xf32>
    %239 = arith.mulf %234, %238 : vector<16x32xf32>
    %240 = vector.broadcast %219 : vector<1x32xf32> to vector<16x32xf32>
    %241 = arith.mulf %239, %240 : vector<16x32xf32>
    %242 = vector.broadcast %221 : vector<1x32xf32> to vector<16x32xf32>
    %243 = arith.addf %241, %242 : vector<16x32xf32>
    %c1 = arith.constant 1 : index
    %c0_90 = arith.constant 0 : index
    %c0_91 = arith.constant 0 : index
    %244 = vector.load %arg5[%c1, %c0_90, %c0_91] : memref<2x32x96xbf16, #tpu.memory_space<vmem>>, vector<1x32x96xbf16>
    %245 = vector.shape_cast %244 : vector<1x32x96xbf16> to vector<32x96xbf16>
    %c1_92 = arith.constant 1 : index
    %c0_93 = arith.constant 0 : index
    %c0_94 = arith.constant 0 : index
    %246 = vector.load %arg7[%c1_92, %c0_93, %c0_94] : memref<2x32x32xbf16, #tpu.memory_space<vmem>>, vector<1x32x32xbf16>
    %247 = vector.shape_cast %246 : vector<1x32x32xbf16> to vector<32x32xbf16>
    %248 = arith.truncf %243 : vector<16x32xf32> to vector<16x32xbf16>
    %cst_95 = arith.constant dense<0.000000e+00> : vector<16x96xf32>
    %249 = tpu.matmul %248, %245, %cst_95 {dimension_numbers = #tpu.dot_dimension_numbers<[1], [0], [0], [1], [0, 0, 1, 1], [], []>} : vector<16x32xbf16>, vector<32x96xbf16>, vector<16x96xf32> -> vector<16x96xf32>
    %c1_96 = arith.constant 1 : index
    %c0_97 = arith.constant 0 : index
    %c0_98 = arith.constant 0 : index
    %250 = vector.load %arg6[%c1_96, %c0_97, %c0_98] : memref<2x1x96xf32, #tpu.memory_space<vmem>>, vector<1x1x96xf32>
    %251 = vector.shape_cast %250 : vector<1x1x96xf32> to vector<1x96xf32>
    %252 = vector.broadcast %251 : vector<1x96xf32> to vector<16x96xf32>
    %253 = arith.addf %249, %252 : vector<16x96xf32>
    %cst_99 = arith.constant 0.000000e+00 : f32
    %254 = vector.broadcast %cst_99 : f32 to vector<16x32xf32>
    %255 = vector.extract_strided_slice %253 {offsets = [0, 0], sizes = [16, 8], strides = [1, 1]} : vector<16x96xf32> to vector<16x8xf32>
    %256 = vector.shape_cast %255 : vector<16x8xf32> to vector<2x8x8xf32>
    %257 = vector.extract_strided_slice %253 {offsets = [0, 32], sizes = [16, 8], strides = [1, 1]} : vector<16x96xf32> to vector<16x8xf32>
    %258 = vector.shape_cast %257 : vector<16x8xf32> to vector<2x8x8xf32>
    %259 = vector.extract_strided_slice %253 {offsets = [0, 64], sizes = [16, 8], strides = [1, 1]} : vector<16x96xf32> to vector<16x8xf32>
    %260 = vector.shape_cast %259 : vector<16x8xf32> to vector<2x8x8xf32>
    %261 = arith.truncf %256 : vector<2x8x8xf32> to vector<2x8x8xbf16>
    %262 = arith.truncf %258 : vector<2x8x8xf32> to vector<2x8x8xbf16>
    "tpu.trace_start"() <{level = 10 : i32, message = "bqd,bkd->bqk"}> : () -> ()
    %cst_100 = arith.constant dense<0.000000e+00> : vector<2x8x8xf32>
    %263 = tpu.matmul %261, %262, %cst_100 {dimension_numbers = #tpu.dot_dimension_numbers<[2], [2], [1], [1], [0, 0, 0, 1, 1, 1], [0], [0]>} : vector<2x8x8xbf16>, vector<2x8x8xbf16>, vector<2x8x8xf32> -> vector<2x8x8xf32>
    "tpu.trace_stop"() : () -> ()
    %cst_101 = arith.constant 0.353553385 : f32
    %264 = vector.broadcast %cst_101 : f32 to vector<2x8x8xf32>
    %265 = arith.mulf %263, %264 : vector<2x8x8xf32>
    %266 = arith.addf %265, %25 : vector<2x8x8xf32>
    %cst_102 = arith.constant dense<0xFF800000> : vector<2x8xf32>
    %267 = vector.multi_reduction <maximumf>, %266, %cst_102 [2] : vector<2x8x8xf32> to vector<2x8xf32>
    %268 = vector.shape_cast %267 : vector<2x8xf32> to vector<2x8x1xf32>
    %269 = vector.broadcast %268 : vector<2x8x1xf32> to vector<2x8x8xf32>
    %270 = arith.subf %266, %269 : vector<2x8x8xf32>
    %271 = math.exp %270 : vector<2x8x8xf32>
    %cst_103 = arith.constant dense<0.000000e+00> : vector<2x8xf32>
    %272 = vector.multi_reduction <add>, %271, %cst_103 [2] : vector<2x8x8xf32> to vector<2x8xf32>
    %273 = vector.shape_cast %272 : vector<2x8xf32> to vector<2x8x1xf32>
    %274 = tpu.reciprocal %273 {approx = true} : vector<2x8x1xf32> -> vector<2x8x1xf32>
    %275 = vector.broadcast %274 : vector<2x8x1xf32> to vector<2x8x8xf32>
    %276 = arith.mulf %271, %275 : vector<2x8x8xf32>
    %277 = arith.truncf %276 : vector<2x8x8xf32> to vector<2x8x8xbf16>
    %278 = arith.truncf %260 : vector<2x8x8xf32> to vector<2x8x8xbf16>
    "tpu.trace_start"() <{level = 10 : i32, message = "bqk,bkd->bqd"}> : () -> ()
    %cst_104 = arith.constant dense<0.000000e+00> : vector<2x8x8xf32>
    %279 = tpu.matmul %277, %278, %cst_104 {dimension_numbers = #tpu.dot_dimension_numbers<[2], [1], [1], [2], [0, 0, 0, 1, 1, 2], [0], [0]>} : vector<2x8x8xbf16>, vector<2x8x8xbf16>, vector<2x8x8xf32> -> vector<2x8x8xf32>
    "tpu.trace_stop"() : () -> ()
    %280 = vector.shape_cast %279 : vector<2x8x8xf32> to vector<16x8xf32>
    %281 = arith.truncf %280 : vector<16x8xf32> to vector<16x8xbf16>
    %282 = vector.extract_strided_slice %247 {offsets = [0, 0], sizes = [8, 32], strides = [1, 1]} : vector<32x32xbf16> to vector<8x32xbf16>
    %cst_105 = arith.constant dense<0.000000e+00> : vector<16x32xf32>
    %283 = tpu.matmul %281, %282, %cst_105 {dimension_numbers = #tpu.dot_dimension_numbers<[1], [0], [0], [1], [0, 0, 1, 1], [], []>} : vector<16x8xbf16>, vector<8x32xbf16>, vector<16x32xf32> -> vector<16x32xf32>
    %284 = arith.addf %254, %283 : vector<16x32xf32>
    %285 = vector.extract_strided_slice %253 {offsets = [0, 8], sizes = [16, 8], strides = [1, 1]} : vector<16x96xf32> to vector<16x8xf32>
    %286 = vector.shape_cast %285 : vector<16x8xf32> to vector<2x8x8xf32>
    %287 = vector.extract_strided_slice %253 {offsets = [0, 40], sizes = [16, 8], strides = [1, 1]} : vector<16x96xf32> to vector<16x8xf32>
    %288 = vector.shape_cast %287 : vector<16x8xf32> to vector<2x8x8xf32>
    %289 = vector.extract_strided_slice %253 {offsets = [0, 72], sizes = [16, 8], strides = [1, 1]} : vector<16x96xf32> to vector<16x8xf32>
    %290 = vector.shape_cast %289 : vector<16x8xf32> to vector<2x8x8xf32>
    %291 = arith.truncf %286 : vector<2x8x8xf32> to vector<2x8x8xbf16>
    %292 = arith.truncf %288 : vector<2x8x8xf32> to vector<2x8x8xbf16>
    "tpu.trace_start"() <{level = 10 : i32, message = "bqd,bkd->bqk"}> : () -> ()
    %cst_106 = arith.constant dense<0.000000e+00> : vector<2x8x8xf32>
    %293 = tpu.matmul %291, %292, %cst_106 {dimension_numbers = #tpu.dot_dimension_numbers<[2], [2], [1], [1], [0, 0, 0, 1, 1, 1], [0], [0]>} : vector<2x8x8xbf16>, vector<2x8x8xbf16>, vector<2x8x8xf32> -> vector<2x8x8xf32>
    "tpu.trace_stop"() : () -> ()
    %cst_107 = arith.constant 0.353553385 : f32
    %294 = vector.broadcast %cst_107 : f32 to vector<2x8x8xf32>
    %295 = arith.mulf %293, %294 : vector<2x8x8xf32>
    %296 = arith.addf %295, %25 : vector<2x8x8xf32>
    %cst_108 = arith.constant dense<0xFF800000> : vector<2x8xf32>
    %297 = vector.multi_reduction <maximumf>, %296, %cst_108 [2] : vector<2x8x8xf32> to vector<2x8xf32>
    %298 = vector.shape_cast %297 : vector<2x8xf32> to vector<2x8x1xf32>
    %299 = vector.broadcast %298 : vector<2x8x1xf32> to vector<2x8x8xf32>
    %300 = arith.subf %296, %299 : vector<2x8x8xf32>
    %301 = math.exp %300 : vector<2x8x8xf32>
    %cst_109 = arith.constant dense<0.000000e+00> : vector<2x8xf32>
    %302 = vector.multi_reduction <add>, %301, %cst_109 [2] : vector<2x8x8xf32> to vector<2x8xf32>
    %303 = vector.shape_cast %302 : vector<2x8xf32> to vector<2x8x1xf32>
    %304 = tpu.reciprocal %303 {approx = true} : vector<2x8x1xf32> -> vector<2x8x1xf32>
    %305 = vector.broadcast %304 : vector<2x8x1xf32> to vector<2x8x8xf32>
    %306 = arith.mulf %301, %305 : vector<2x8x8xf32>
    %307 = arith.truncf %306 : vector<2x8x8xf32> to vector<2x8x8xbf16>
    %308 = arith.truncf %290 : vector<2x8x8xf32> to vector<2x8x8xbf16>
    "tpu.trace_start"() <{level = 10 : i32, message = "bqk,bkd->bqd"}> : () -> ()
    %cst_110 = arith.constant dense<0.000000e+00> : vector<2x8x8xf32>
    %309 = tpu.matmul %307, %308, %cst_110 {dimension_numbers = #tpu.dot_dimension_numbers<[2], [1], [1], [2], [0, 0, 0, 1, 1, 2], [0], [0]>} : vector<2x8x8xbf16>, vector<2x8x8xbf16>, vector<2x8x8xf32> -> vector<2x8x8xf32>
    "tpu.trace_stop"() : () -> ()
    %310 = vector.shape_cast %309 : vector<2x8x8xf32> to vector<16x8xf32>
    %311 = arith.truncf %310 : vector<16x8xf32> to vector<16x8xbf16>
    %312 = vector.extract_strided_slice %247 {offsets = [8, 0], sizes = [8, 32], strides = [1, 1]} : vector<32x32xbf16> to vector<8x32xbf16>
    %cst_111 = arith.constant dense<0.000000e+00> : vector<16x32xf32>
    %313 = tpu.matmul %311, %312, %cst_111 {dimension_numbers = #tpu.dot_dimension_numbers<[1], [0], [0], [1], [0, 0, 1, 1], [], []>} : vector<16x8xbf16>, vector<8x32xbf16>, vector<16x32xf32> -> vector<16x32xf32>
    %314 = arith.addf %284, %313 : vector<16x32xf32>
    %315 = vector.extract_strided_slice %253 {offsets = [0, 16], sizes = [16, 8], strides = [1, 1]} : vector<16x96xf32> to vector<16x8xf32>
    %316 = vector.shape_cast %315 : vector<16x8xf32> to vector<2x8x8xf32>
    %317 = vector.extract_strided_slice %253 {offsets = [0, 48], sizes = [16, 8], strides = [1, 1]} : vector<16x96xf32> to vector<16x8xf32>
    %318 = vector.shape_cast %317 : vector<16x8xf32> to vector<2x8x8xf32>
    %319 = vector.extract_strided_slice %253 {offsets = [0, 80], sizes = [16, 8], strides = [1, 1]} : vector<16x96xf32> to vector<16x8xf32>
    %320 = vector.shape_cast %319 : vector<16x8xf32> to vector<2x8x8xf32>
    %321 = arith.truncf %316 : vector<2x8x8xf32> to vector<2x8x8xbf16>
    %322 = arith.truncf %318 : vector<2x8x8xf32> to vector<2x8x8xbf16>
    "tpu.trace_start"() <{level = 10 : i32, message = "bqd,bkd->bqk"}> : () -> ()
    %cst_112 = arith.constant dense<0.000000e+00> : vector<2x8x8xf32>
    %323 = tpu.matmul %321, %322, %cst_112 {dimension_numbers = #tpu.dot_dimension_numbers<[2], [2], [1], [1], [0, 0, 0, 1, 1, 1], [0], [0]>} : vector<2x8x8xbf16>, vector<2x8x8xbf16>, vector<2x8x8xf32> -> vector<2x8x8xf32>
    "tpu.trace_stop"() : () -> ()
    %cst_113 = arith.constant 0.353553385 : f32
    %324 = vector.broadcast %cst_113 : f32 to vector<2x8x8xf32>
    %325 = arith.mulf %323, %324 : vector<2x8x8xf32>
    %326 = arith.addf %325, %25 : vector<2x8x8xf32>
    %cst_114 = arith.constant dense<0xFF800000> : vector<2x8xf32>
    %327 = vector.multi_reduction <maximumf>, %326, %cst_114 [2] : vector<2x8x8xf32> to vector<2x8xf32>
    %328 = vector.shape_cast %327 : vector<2x8xf32> to vector<2x8x1xf32>
    %329 = vector.broadcast %328 : vector<2x8x1xf32> to vector<2x8x8xf32>
    %330 = arith.subf %326, %329 : vector<2x8x8xf32>
    %331 = math.exp %330 : vector<2x8x8xf32>
    %cst_115 = arith.constant dense<0.000000e+00> : vector<2x8xf32>
    %332 = vector.multi_reduction <add>, %331, %cst_115 [2] : vector<2x8x8xf32> to vector<2x8xf32>
    %333 = vector.shape_cast %332 : vector<2x8xf32> to vector<2x8x1xf32>
    %334 = tpu.reciprocal %333 {approx = true} : vector<2x8x1xf32> -> vector<2x8x1xf32>
    %335 = vector.broadcast %334 : vector<2x8x1xf32> to vector<2x8x8xf32>
    %336 = arith.mulf %331, %335 : vector<2x8x8xf32>
    %337 = arith.truncf %336 : vector<2x8x8xf32> to vector<2x8x8xbf16>
    %338 = arith.truncf %320 : vector<2x8x8xf32> to vector<2x8x8xbf16>
    "tpu.trace_start"() <{level = 10 : i32, message = "bqk,bkd->bqd"}> : () -> ()
    %cst_116 = arith.constant dense<0.000000e+00> : vector<2x8x8xf32>
    %339 = tpu.matmul %337, %338, %cst_116 {dimension_numbers = #tpu.dot_dimension_numbers<[2], [1], [1], [2], [0, 0, 0, 1, 1, 2], [0], [0]>} : vector<2x8x8xbf16>, vector<2x8x8xbf16>, vector<2x8x8xf32> -> vector<2x8x8xf32>
    "tpu.trace_stop"() : () -> ()
    %340 = vector.shape_cast %339 : vector<2x8x8xf32> to vector<16x8xf32>
    %341 = arith.truncf %340 : vector<16x8xf32> to vector<16x8xbf16>
    %342 = vector.extract_strided_slice %247 {offsets = [16, 0], sizes = [8, 32], strides = [1, 1]} : vector<32x32xbf16> to vector<8x32xbf16>
    %cst_117 = arith.constant dense<0.000000e+00> : vector<16x32xf32>
    %343 = tpu.matmul %341, %342, %cst_117 {dimension_numbers = #tpu.dot_dimension_numbers<[1], [0], [0], [1], [0, 0, 1, 1], [], []>} : vector<16x8xbf16>, vector<8x32xbf16>, vector<16x32xf32> -> vector<16x32xf32>
    %344 = arith.addf %314, %343 : vector<16x32xf32>
    %345 = vector.extract_strided_slice %253 {offsets = [0, 24], sizes = [16, 8], strides = [1, 1]} : vector<16x96xf32> to vector<16x8xf32>
    %346 = vector.shape_cast %345 : vector<16x8xf32> to vector<2x8x8xf32>
    %347 = vector.extract_strided_slice %253 {offsets = [0, 56], sizes = [16, 8], strides = [1, 1]} : vector<16x96xf32> to vector<16x8xf32>
    %348 = vector.shape_cast %347 : vector<16x8xf32> to vector<2x8x8xf32>
    %349 = vector.extract_strided_slice %253 {offsets = [0, 88], sizes = [16, 8], strides = [1, 1]} : vector<16x96xf32> to vector<16x8xf32>
    %350 = vector.shape_cast %349 : vector<16x8xf32> to vector<2x8x8xf32>
    %351 = arith.truncf %346 : vector<2x8x8xf32> to vector<2x8x8xbf16>
    %352 = arith.truncf %348 : vector<2x8x8xf32> to vector<2x8x8xbf16>
    "tpu.trace_start"() <{level = 10 : i32, message = "bqd,bkd->bqk"}> : () -> ()
    %cst_118 = arith.constant dense<0.000000e+00> : vector<2x8x8xf32>
    %353 = tpu.matmul %351, %352, %cst_118 {dimension_numbers = #tpu.dot_dimension_numbers<[2], [2], [1], [1], [0, 0, 0, 1, 1, 1], [0], [0]>} : vector<2x8x8xbf16>, vector<2x8x8xbf16>, vector<2x8x8xf32> -> vector<2x8x8xf32>
    "tpu.trace_stop"() : () -> ()
    %cst_119 = arith.constant 0.353553385 : f32
    %354 = vector.broadcast %cst_119 : f32 to vector<2x8x8xf32>
    %355 = arith.mulf %353, %354 : vector<2x8x8xf32>
    %356 = arith.addf %355, %25 : vector<2x8x8xf32>
    %cst_120 = arith.constant dense<0xFF800000> : vector<2x8xf32>
    %357 = vector.multi_reduction <maximumf>, %356, %cst_120 [2] : vector<2x8x8xf32> to vector<2x8xf32>
    %358 = vector.shape_cast %357 : vector<2x8xf32> to vector<2x8x1xf32>
    %359 = vector.broadcast %358 : vector<2x8x1xf32> to vector<2x8x8xf32>
    %360 = arith.subf %356, %359 : vector<2x8x8xf32>
    %361 = math.exp %360 : vector<2x8x8xf32>
    %cst_121 = arith.constant dense<0.000000e+00> : vector<2x8xf32>
    %362 = vector.multi_reduction <add>, %361, %cst_121 [2] : vector<2x8x8xf32> to vector<2x8xf32>
    %363 = vector.shape_cast %362 : vector<2x8xf32> to vector<2x8x1xf32>
    %364 = tpu.reciprocal %363 {approx = true} : vector<2x8x1xf32> -> vector<2x8x1xf32>
    %365 = vector.broadcast %364 : vector<2x8x1xf32> to vector<2x8x8xf32>
    %366 = arith.mulf %361, %365 : vector<2x8x8xf32>
    %367 = arith.truncf %366 : vector<2x8x8xf32> to vector<2x8x8xbf16>
    %368 = arith.truncf %350 : vector<2x8x8xf32> to vector<2x8x8xbf16>
    "tpu.trace_start"() <{level = 10 : i32, message = "bqk,bkd->bqd"}> : () -> ()
    %cst_122 = arith.constant dense<0.000000e+00> : vector<2x8x8xf32>
    %369 = tpu.matmul %367, %368, %cst_122 {dimension_numbers = #tpu.dot_dimension_numbers<[2], [1], [1], [2], [0, 0, 0, 1, 1, 2], [0], [0]>} : vector<2x8x8xbf16>, vector<2x8x8xbf16>, vector<2x8x8xf32> -> vector<2x8x8xf32>
    "tpu.trace_stop"() : () -> ()
    %370 = vector.shape_cast %369 : vector<2x8x8xf32> to vector<16x8xf32>
    %371 = arith.truncf %370 : vector<16x8xf32> to vector<16x8xbf16>
    %372 = vector.extract_strided_slice %247 {offsets = [24, 0], sizes = [8, 32], strides = [1, 1]} : vector<32x32xbf16> to vector<8x32xbf16>
    %cst_123 = arith.constant dense<0.000000e+00> : vector<16x32xf32>
    %373 = tpu.matmul %371, %372, %cst_123 {dimension_numbers = #tpu.dot_dimension_numbers<[1], [0], [0], [1], [0, 0, 1, 1], [], []>} : vector<16x8xbf16>, vector<8x32xbf16>, vector<16x32xf32> -> vector<16x32xf32>
    %374 = arith.addf %344, %373 : vector<16x32xf32>
    %c1_124 = arith.constant 1 : index
    %c0_125 = arith.constant 0 : index
    %c0_126 = arith.constant 0 : index
    %375 = vector.load %arg8[%c1_124, %c0_125, %c0_126] : memref<2x1x32xf32, #tpu.memory_space<vmem>>, vector<1x1x32xf32>
    %376 = vector.shape_cast %375 : vector<1x1x32xf32> to vector<1x32xf32>
    %377 = vector.broadcast %376 : vector<1x32xf32> to vector<16x32xf32>
    %378 = arith.addf %374, %377 : vector<16x32xf32>
    %379 = arith.addf %243, %378 : vector<16x32xf32>
    %c1_127 = arith.constant 1 : index
    %c0_128 = arith.constant 0 : index
    %c0_129 = arith.constant 0 : index
    %380 = vector.load %arg9[%c1_127, %c0_128, %c0_129] : memref<2x1x32xf32, #tpu.memory_space<vmem>>, vector<1x1x32xf32>
    %381 = vector.shape_cast %380 : vector<1x1x32xf32> to vector<1x32xf32>
    %c1_130 = arith.constant 1 : index
    %c0_131 = arith.constant 0 : index
    %c0_132 = arith.constant 0 : index
    %382 = vector.load %arg10[%c1_130, %c0_131, %c0_132] : memref<2x1x32xf32, #tpu.memory_space<vmem>>, vector<1x1x32xf32>
    %383 = vector.shape_cast %382 : vector<1x1x32xf32> to vector<1x32xf32>
    %cst_133 = arith.constant dense<0.000000e+00> : vector<16xf32>
    %384 = vector.multi_reduction <add>, %379, %cst_133 [1] : vector<16x32xf32> to vector<16xf32>
    %385 = vector.shape_cast %384 : vector<16xf32> to vector<16x1xf32>
    %cst_134 = arith.constant 3.200000e+01 : f32
    %386 = vector.broadcast %cst_134 : f32 to vector<16x1xf32>
    %387 = arith.divf %385, %386 : vector<16x1xf32>
    %388 = vector.broadcast %387 : vector<16x1xf32> to vector<16x32xf32>
    %389 = arith.subf %379, %388 : vector<16x32xf32>
    %390 = arith.mulf %389, %389 : vector<16x32xf32>
    %cst_135 = arith.constant dense<0.000000e+00> : vector<16xf32>
    %391 = vector.multi_reduction <add>, %390, %cst_135 [1] : vector<16x32xf32> to vector<16xf32>
    %392 = vector.shape_cast %391 : vector<16xf32> to vector<16x1xf32>
    %cst_136 = arith.constant 3.200000e+01 : f32
    %393 = vector.broadcast %cst_136 : f32 to vector<16x1xf32>
    %394 = arith.divf %392, %393 : vector<16x1xf32>
    %395 = vector.broadcast %387 : vector<16x1xf32> to vector<16x32xf32>
    %396 = arith.subf %379, %395 : vector<16x32xf32>
    %cst_137 = arith.constant 9.99999996E-13 : f32
    %397 = vector.broadcast %cst_137 : f32 to vector<16x1xf32>
    %398 = arith.addf %394, %397 : vector<16x1xf32>
    %399 = math.rsqrt %398 : vector<16x1xf32>
    %400 = vector.broadcast %399 : vector<16x1xf32> to vector<16x32xf32>
    %401 = arith.mulf %396, %400 : vector<16x32xf32>
    %402 = vector.broadcast %381 : vector<1x32xf32> to vector<16x32xf32>
    %403 = arith.mulf %401, %402 : vector<16x32xf32>
    %404 = vector.broadcast %383 : vector<1x32xf32> to vector<16x32xf32>
    %405 = arith.addf %403, %404 : vector<16x32xf32>
    %406 = arith.truncf %405 : vector<16x32xf32> to vector<16x32xbf16>
    %c1_138 = arith.constant 1 : index
    %c0_139 = arith.constant 0 : index
    %c0_140 = arith.constant 0 : index
    %407 = vector.load %arg11[%c1_138, %c0_139, %c0_140] : memref<2x32x64xbf16, #tpu.memory_space<vmem>>, vector<1x32x64xbf16>
    %408 = vector.shape_cast %407 : vector<1x32x64xbf16> to vector<32x64xbf16>
    %cst_141 = arith.constant dense<0.000000e+00> : vector<16x64xf32>
    %409 = tpu.matmul %406, %408, %cst_141 {dimension_numbers = #tpu.dot_dimension_numbers<[1], [0], [0], [1], [0, 0, 1, 1], [], []>} : vector<16x32xbf16>, vector<32x64xbf16>, vector<16x64xf32> -> vector<16x64xf32>
    %c1_142 = arith.constant 1 : index
    %c0_143 = arith.constant 0 : index
    %c0_144 = arith.constant 0 : index
    %410 = vector.load %arg12[%c1_142, %c0_143, %c0_144] : memref<2x1x64xf32, #tpu.memory_space<vmem>>, vector<1x1x64xf32>
    %411 = vector.shape_cast %410 : vector<1x1x64xf32> to vector<1x64xf32>
    %412 = vector.broadcast %411 : vector<1x64xf32> to vector<16x64xf32>
    %413 = arith.addf %409, %412 : vector<16x64xf32>
    %414 = arith.mulf %413, %413 : vector<16x64xf32>
    %415 = arith.mulf %413, %414 : vector<16x64xf32>
    %cst_145 = arith.constant 4.471500e-02 : f32
    %416 = vector.broadcast %cst_145 : f32 to vector<16x64xf32>
    %417 = arith.mulf %416, %415 : vector<16x64xf32>
    %418 = arith.addf %413, %417 : vector<16x64xf32>
    %cst_146 = arith.constant 0.797884583 : f32
    %419 = vector.broadcast %cst_146 : f32 to vector<16x64xf32>
    %420 = arith.mulf %419, %418 : vector<16x64xf32>
    %421 = math.tanh %420 : vector<16x64xf32>
    %cst_147 = arith.constant 1.000000e+00 : f32
    %422 = vector.broadcast %cst_147 : f32 to vector<16x64xf32>
    %423 = arith.addf %422, %421 : vector<16x64xf32>
    %cst_148 = arith.constant 5.000000e-01 : f32
    %424 = vector.broadcast %cst_148 : f32 to vector<16x64xf32>
    %425 = arith.mulf %424, %423 : vector<16x64xf32>
    %426 = arith.mulf %413, %425 : vector<16x64xf32>
    %427 = arith.truncf %426 : vector<16x64xf32> to vector<16x64xbf16>
    %c1_149 = arith.constant 1 : index
    %c0_150 = arith.constant 0 : index
    %c0_151 = arith.constant 0 : index
    %428 = vector.load %arg13[%c1_149, %c0_150, %c0_151] : memref<2x64x32xbf16, #tpu.memory_space<vmem>>, vector<1x64x32xbf16>
    %429 = vector.shape_cast %428 : vector<1x64x32xbf16> to vector<64x32xbf16>
    %cst_152 = arith.constant dense<0.000000e+00> : vector<16x32xf32>
    %430 = tpu.matmul %427, %429, %cst_152 {dimension_numbers = #tpu.dot_dimension_numbers<[1], [0], [0], [1], [0, 0, 1, 1], [], []>} : vector<16x64xbf16>, vector<64x32xbf16>, vector<16x32xf32> -> vector<16x32xf32>
    %c1_153 = arith.constant 1 : index
    %c0_154 = arith.constant 0 : index
    %c0_155 = arith.constant 0 : index
    %431 = vector.load %arg14[%c1_153, %c0_154, %c0_155] : memref<2x1x32xf32, #tpu.memory_space<vmem>>, vector<1x1x32xf32>
    %432 = vector.shape_cast %431 : vector<1x1x32xf32> to vector<1x32xf32>
    %433 = vector.broadcast %432 : vector<1x32xf32> to vector<16x32xf32>
    %434 = arith.addf %430, %433 : vector<16x32xf32>
    %435 = arith.addf %405, %434 : vector<16x32xf32>
    %c1_156 = arith.constant 1 : index
    %c0_157 = arith.constant 0 : index
    %c0_158 = arith.constant 0 : index
    %436 = vector.load %arg15[%c1_156, %c0_157, %c0_158] : memref<2x1x32xf32, #tpu.memory_space<vmem>>, vector<1x1x32xf32>
    %437 = vector.shape_cast %436 : vector<1x1x32xf32> to vector<1x32xf32>
    %c1_159 = arith.constant 1 : index
    %c0_160 = arith.constant 0 : index
    %c0_161 = arith.constant 0 : index
    %438 = vector.load %arg16[%c1_159, %c0_160, %c0_161] : memref<2x1x32xf32, #tpu.memory_space<vmem>>, vector<1x1x32xf32>
    %439 = vector.shape_cast %438 : vector<1x1x32xf32> to vector<1x32xf32>
    %cst_162 = arith.constant dense<0.000000e+00> : vector<16xf32>
    %440 = vector.multi_reduction <add>, %435, %cst_162 [1] : vector<16x32xf32> to vector<16xf32>
    %441 = vector.shape_cast %440 : vector<16xf32> to vector<16x1xf32>
    %cst_163 = arith.constant 3.200000e+01 : f32
    %442 = vector.broadcast %cst_163 : f32 to vector<16x1xf32>
    %443 = arith.divf %441, %442 : vector<16x1xf32>
    %444 = vector.broadcast %443 : vector<16x1xf32> to vector<16x32xf32>
    %445 = arith.subf %435, %444 : vector<16x32xf32>
    %446 = arith.mulf %445, %445 : vector<16x32xf32>
    %cst_164 = arith.constant dense<0.000000e+00> : vector<16xf32>
    %447 = vector.multi_reduction <add>, %446, %cst_164 [1] : vector<16x32xf32> to vector<16xf32>
    %448 = vector.shape_cast %447 : vector<16xf32> to vector<16x1xf32>
    %cst_165 = arith.constant 3.200000e+01 : f32
    %449 = vector.broadcast %cst_165 : f32 to vector<16x1xf32>
    %450 = arith.divf %448, %449 : vector<16x1xf32>
    %451 = vector.broadcast %443 : vector<16x1xf32> to vector<16x32xf32>
    %452 = arith.subf %435, %451 : vector<16x32xf32>
    %cst_166 = arith.constant 9.99999996E-13 : f32
    %453 = vector.broadcast %cst_166 : f32 to vector<16x1xf32>
    %454 = arith.addf %450, %453 : vector<16x1xf32>
    %455 = math.rsqrt %454 : vector<16x1xf32>
    %456 = vector.broadcast %455 : vector<16x1xf32> to vector<16x32xf32>
    %457 = arith.mulf %452, %456 : vector<16x32xf32>
    %458 = vector.broadcast %437 : vector<1x32xf32> to vector<16x32xf32>
    %459 = arith.mulf %457, %458 : vector<16x32xf32>
    %460 = vector.broadcast %439 : vector<1x32xf32> to vector<16x32xf32>
    %461 = arith.addf %459, %460 : vector<16x32xf32>
    %462 = vector.extract_strided_slice %461 {offsets = [0, 0], sizes = [1, 32], strides = [1, 1]} : vector<16x32xf32> to vector<1x32xf32>
    %463 = vector.extract_strided_slice %461 {offsets = [8, 0], sizes = [1, 32], strides = [1, 1]} : vector<16x32xf32> to vector<1x32xf32>
    %464 = tpu.concatenate %462, %463 in 0 : vector<1x32xf32>, vector<1x32xf32> -> vector<2x32xf32>
    %465 = arith.truncf %464 : vector<2x32xf32> to vector<2x32xbf16>
    %c0_167 = arith.constant 0 : index
    %c0_168 = arith.constant 0 : index
    %466 = vector.load %arg17[%c0_167, %c0_168] : memref<32x32xbf16, #tpu.memory_space<vmem>>, vector<32x32xbf16>
    %cst_169 = arith.constant dense<0.000000e+00> : vector<2x32xf32>
    %467 = tpu.matmul %465, %466, %cst_169 {dimension_numbers = #tpu.dot_dimension_numbers<[1], [0], [0], [1], [0, 0, 1, 1], [], []>} : vector<2x32xbf16>, vector<32x32xbf16>, vector<2x32xf32> -> vector<2x32xf32>
    %c0_170 = arith.constant 0 : index
    %c0_171 = arith.constant 0 : index
    %468 = vector.load %arg18[%c0_170, %c0_171] : memref<1x32xf32, #tpu.memory_space<vmem>>, vector<1x32xf32>
    %469 = vector.broadcast %468 : vector<1x32xf32> to vector<2x32xf32>
    %470 = arith.addf %467, %469 : vector<2x32xf32>
    %471 = math.tanh %470 : vector<2x32xf32>
    %c0_172 = arith.constant 0 : index
    %c0_173 = arith.constant 0 : index
    %472 = vector.load %arg19[%c0_172, %c0_173] : memref<2x32xf32, #tpu.memory_space<vmem>>, vector<2x32xf32>
    tpu.vector_store %arg19[%c0_172, %c0_173], %471 {strides = array<i32>} : memref<2x32xf32, #tpu.memory_space<vmem>>, vector<2x32xf32>,
    return
  }
  func.func @transform_0(%arg0: i32) -> (i32, i32) {
    %c0_i32 = arith.constant 0 : i32
    %c0_i32_0 = arith.constant 0 : i32
    %c0_i32_1 = arith.constant 0 : i32
    return %c0_i32, %c0_i32_0 : i32, i32
  }
  func.func @transform_1(%arg0: i32) -> (i32, i32, i32) {
    %c0_i32 = arith.constant 0 : i32
    %c0_i32_0 = arith.constant 0 : i32
    %c0_i32_1 = arith.constant 0 : i32
    %c0_i32_2 = arith.constant 0 : i32
    return %c0_i32, %c0_i32_0, %c0_i32_1 : i32, i32, i32
  }
  func.func @transform_2(%arg0: i32) -> (i32, i32) {
    %c0_i32 = arith.constant 0 : i32
    %c0_i32_0 = arith.constant 0 : i32
    %c0_i32_1 = arith.constant 0 : i32
    return %c0_i32, %c0_i32_0 : i32, i32
  }
  func.func @transform_3(%arg0: i32) -> (i32, i32) {
    %c0_i32 = arith.constant 0 : i32
    %c0_i32_0 = arith.constant 0 : i32
    %c0_i32_1 = arith.constant 0 : i32
    return %c0_i32, %c0_i32_0 : i32, i32
  }
  func.func @transform_4(%arg0: i32) -> (i32, i32, i32) {
    %c0_i32 = arith.constant 0 : i32
    %c0_i32_0 = arith.constant 0 : i32
    %c0_i32_1 = arith.constant 0 : i32
    %c0_i32_2 = arith.constant 0 : i32
    return %c0_i32, %c0_i32_0, %c0_i32_1 : i32, i32, i32
  }
  func.func @transform_5(%arg0: i32) -> (i32, i32, i32) {
    %c0_i32 = arith.constant 0 : i32
    %c0_i32_0 = arith.constant 0 : i32
    %c0_i32_1 = arith.constant 0 : i32
    %c0_i32_2 = arith.constant 0 : i32
    return %c0_i32, %c0_i32_0, %c0_i32_1 : i32, i32, i32
  }
  func.func @transform_6(%arg0: i32) -> (i32, i32, i32) {
    %c0_i32 = arith.constant 0 : i32
    %c0_i32_0 = arith.constant 0 : i32
    %c0_i32_1 = arith.constant 0 : i32
    %c0_i32_2 = arith.constant 0 : i32
    return %c0_i32, %c0_i32_0, %c0_i32_1 : i32, i32, i32
  }
  func.func @transform_7(%arg0: i32) -> (i32, i32, i32) {
    %c0_i32 = arith.constant 0 : i32
    %c0_i32_0 = arith.constant 0 : i32
    %c0_i32_1 = arith.constant 0 : i32
    %c0_i32_2 = arith.constant 0 : i32
    return %c0_i32, %c0_i32_0, %c0_i32_1 : i32, i32, i32
  }
  func.func @transform_8(%arg0: i32) -> (i32, i32, i32) {
    %c0_i32 = arith.constant 0 : i32
    %c0_i32_0 = arith.constant 0 : i32
    %c0_i32_1 = arith.constant 0 : i32
    %c0_i32_2 = arith.constant 0 : i32
    return %c0_i32, %c0_i32_0, %c0_i32_1 : i32, i32, i32
  }
  func.func @transform_9(%arg0: i32) -> (i32, i32, i32) {
    %c0_i32 = arith.constant 0 : i32
    %c0_i32_0 = arith.constant 0 : i32
    %c0_i32_1 = arith.constant 0 : i32
    %c0_i32_2 = arith.constant 0 : i32
    return %c0_i32, %c0_i32_0, %c0_i32_1 : i32, i32, i32
  }
  func.func @transform_10(%arg0: i32) -> (i32, i32, i32) {
    %c0_i32 = arith.constant 0 : i32
    %c0_i32_0 = arith.constant 0 : i32
    %c0_i32_1 = arith.constant 0 : i32
    %c0_i32_2 = arith.constant 0 : i32
    return %c0_i32, %c0_i32_0, %c0_i32_1 : i32, i32, i32
  }
  func.func @transform_11(%arg0: i32) -> (i32, i32, i32) {
    %c0_i32 = arith.constant 0 : i32
    %c0_i32_0 = arith.constant 0 : i32
    %c0_i32_1 = arith.constant 0 : i32
    %c0_i32_2 = arith.constant 0 : i32
    return %c0_i32, %c0_i32_0, %c0_i32_1 : i32, i32, i32
  }
  func.func @transform_12(%arg0: i32) -> (i32, i32, i32) {
    %c0_i32 = arith.constant 0 : i32
    %c0_i32_0 = arith.constant 0 : i32
    %c0_i32_1 = arith.constant 0 : i32
    %c0_i32_2 = arith.constant 0 : i32
    return %c0_i32, %c0_i32_0, %c0_i32_1 : i32, i32, i32
  }
  func.func @transform_13(%arg0: i32) -> (i32, i32, i32) {
    %c0_i32 = arith.constant 0 : i32
    %c0_i32_0 = arith.constant 0 : i32
    %c0_i32_1 = arith.constant 0 : i32
    %c0_i32_2 = arith.constant 0 : i32
    return %c0_i32, %c0_i32_0, %c0_i32_1 : i32, i32, i32
  }
  func.func @transform_14(%arg0: i32) -> (i32, i32, i32) {
    %c0_i32 = arith.constant 0 : i32
    %c0_i32_0 = arith.constant 0 : i32
    %c0_i32_1 = arith.constant 0 : i32
    %c0_i32_2 = arith.constant 0 : i32
    return %c0_i32, %c0_i32_0, %c0_i32_1 : i32, i32, i32
  }
  func.func @transform_15(%arg0: i32) -> (i32, i32, i32) {
    %c0_i32 = arith.constant 0 : i32
    %c0_i32_0 = arith.constant 0 : i32
    %c0_i32_1 = arith.constant 0 : i32
    %c0_i32_2 = arith.constant 0 : i32
    return %c0_i32, %c0_i32_0, %c0_i32_1 : i32, i32, i32
  }
  func.func @transform_16(%arg0: i32) -> (i32, i32) {
    %c0_i32 = arith.constant 0 : i32
    %c0_i32_0 = arith.constant 0 : i32
    %c0_i32_1 = arith.constant 0 : i32
    return %c0_i32, %c0_i32_0 : i32, i32
  }
  func.func @transform_17(%arg0: i32) -> (i32, i32) {
    %c0_i32 = arith.constant 0 : i32
    %c0_i32_0 = arith.constant 0 : i32
    %c0_i32_1 = arith.constant 0 : i32
    return %c0_i32, %c0_i32_0 : i32, i32
  }
  func.func @transform_18(%arg0: i32) -> (i32, i32) {
    %c0_i32 = arith.constant 0 : i32
    %c0_i32_0 = arith.constant 0 : i32
    %c0_i32_1 = arith.constant 0 : i32
    return %c0_i32, %c0_i32_0 : i32, i32
  }
}

</mosaic_0001>

<bundles_post_ra>
// kernel: sentence_pair_classifier_forward.1
= control target key start
LH: loop header
LB: loop body
LE: loop exit
PB: predicated region body
PF: predicated region fallthrough
CT: control target
= control target key end

     0   :  { %vm64_vm0 = vcmask 261120   ;;  %v3722_v14 = vmov 0.0   ;;  %vm3723_vm1 = vmmov 0   ;;  %vm187_vm2 = vcmask 64512   ;;  %s3726_s21 = smov 88   ;;  %s3727_s22 = smov 120   ;;  %s4465_s0 = inlined_call_operand.vmem [shape: f32[16,32], index: 0, kind: input, shape index: {}]   ;;  %s4466_s4 = inlined_call_operand.vmem [shape: bf16[2,32,96], index: 4, kind: input, shape index: {}]   ;;  %s4467_s2 = inlined_call_operand.vmem [shape: f32[1,32], index: 2, kind: input, shape index: {}]   ;;  %s4468_s3 = inlined_call_operand.vmem [shape: f32[1,32], index: 3, kind: input, shape index: {}]   ;;  %s4469_s5 = inlined_call_operand.vmem [shape: f32[2,1,96], index: 5, kind: input, shape index: {}]   ;;  %s4470_s1 = inlined_call_operand.vmem [shape: f32[2,8,8], index: 1, kind: input, shape index: {}]   ;;  %s4471_s6 = inlined_call_operand.vmem [shape: bf16[2,32,32], index: 6, kind: input, shape index: {}]   ;;  %s4472_s7 = inlined_call_operand.vmem [shape: f32[2,1,32], index: 7, kind: input, shape index: {}]   ;;  %s4473_s10 = inlined_call_operand.vmem [shape: bf16[2,32,64], index: 10, kind: input, shape index: {}]   ;;  %s4474_s8 = inlined_call_operand.vmem [shape: f32[2,1,32], index: 8, kind: input, shape index: {}]   ;;  %s4475_s9 = inlined_call_operand.vmem [shape: f32[2,1,32], index: 9, kind: input, shape index: {}]   ;;  %s4476_s12 = inlined_call_operand.vmem [shape: bf16[2,64,32], index: 12, kind: input, shape index: {}]   ;;  %s4477_s11 = inlined_call_operand.vmem [shape: f32[2,1,64], index: 11, kind: input, shape index: {}]   ;;  %s4478_s13 = inlined_call_operand.vmem [shape: f32[2,1,32], index: 13, kind: input, shape index: {}]   ;;  %s4479_s14 = inlined_call_operand.vmem [shape: f32[2,1,32], index: 14, kind: input, shape index: {}]   ;;  %s4480_s15 = inlined_call_operand.vmem [shape: f32[2,1,32], index: 15, kind: input, shape index: {}]   ;;  %s4481_s16 = inlined_call_operand.vmem [shape: bf16[32,32], index: 16, kind: input, shape index: {}]   ;;  %s4482_s17 = inlined_call_operand.vmem [shape: f32[1,32], index: 17, kind: input, shape index: {}]   ;;  %s4483_s18 = inlined_call_operand.vmem [shape: f32[2,32], index: 18, kind: output, shape index: {}]  }
   0x1   :  { %4492 = sst [smem:[#allocation2_spill]] %s4465_s0  ;;  %3291 = vmatprep.subr.bf16.mxu0 %v3722_v14  ;;  %3295 = vmatprep.mubr.msk.bf16.mxu0 %vm3723_vm1, %v3722_v14  ;;  %v3075_v29 = vld [vmem:[%s4468_s3] ss:$0 sm:$0xff]  ;;  %s3724_s3 = smov 96   ;;  %v3901_v54 = vld [vmem:[%s4470_s1 + $0x8] sm:$0xff]  ;;  %vm316_vm3 = vcmask 1043456  }
   0x2   :  { %4493 = sst [smem:[#allocation3_spill]] %s4466_s4  ;;  %3299 = vmatprep.subr.bf16.mxu1 %v3722_v14  ;;  %3301 = vmatprep.mubr.msk.bf16.mxu1 %vm3723_vm1, %v3722_v14  ;;  %v3076_v34 = vld [vmem:[%s4469_s5] ss:$0 sm:$0xff]  ;;  %s3725_s4 = smov 64   ;;  %vm1457_vm4 = vcmask 523264   ;;  %vm2998_vm5 = vcmask 1040384  }
   0x3   :  { %4494 = sst [smem:[#allocation4_spill]] %s4467_s2  ;;  %v3895_v48 = vld [vmem:[%s4470_s1] sm:$0xff]  ;;  %s3728_s2 = smov 56   ;;  %vm3068_vm6 = vcmask 254976  }
   0x4   :  { %s4495_s29 = sld [smem:[#allocation2_spill]]  ;;  %s3729_s23 = smov 80  }
   0x5   :  { %s4496_s20 = sld [smem:[#allocation3_spill]]  ;;  %s4490_s30 = smov 72  }
   0x6   :  { %s4497_s24 = sld [smem:[#allocation4_spill]]  ;;  %s4488_s0 = smov 104  }
   0x7   :  { %s4486_s26 = smov 40   ;;  %s4500_s27 = smov 40  }
   0xa   :  { %v60_v0 = vld [vmem:[%s4495_s29] sm:$0xff]  ;;  %v61_v1 = vld [vmem:[%s4495_s29 + $0x8] sm:$0xff]  ;;  %s3731_s29 = smov 48  }
   0xb   :  { %v65_v2 = vsel %vm64_vm0, %v60_v0, 0.0  ;;  %v68_v3 = vsel %vm64_vm0, %v61_v1, 0.0  ;;  %v3608_v15 = vld [vmem:[%s4496_s20 + $0x8] sm:$0xff]   ;;  %v3609_v16 = vld [vmem:[%s4496_s20] sm:$0xff]  }
   0xc   :  { %66 = vadd.xlane.f32.xlu0 %v65_v2  ;;  %3292 = vmatpush3.bf16.msra.mxu0 %v3608_v15  ;;  %v3074_v25 = vld [vmem:[%s4497_s24] ss:$0 sm:$0xff]  ;;  %s3730_s24 = smov 112  }
   0xd   :  { %3293 = vmatprep.subr.bf16.mxu0 %v3722_v14 }
  0x10   :  { %69 = vadd.xlane.f32.xlu0 %v68_v3  ;;  %3294 = vmatpush3.bf16.msra.mxu0 %v3609_v16 }
  0x11   :  { %3305 = vmatprep.subr.bf16.mxu0 %v3722_v14 }
  0x95   :  { %v67_v4 = vpop.xlane.xlu0 %66 }
  0x96   :  { %v72_v5 = vmul.f32 0.03125, %v67_v4 }
  0x98   :  { %v74_v6 = vsub.f32 %v60_v0, %v72_v5 }
  0x99   :  { %v70_v7 = vpop.xlane.xlu0 %69 }
  0x9a   :  { %v73_v8 = vmul.f32 0.03125, %v70_v7  ;;  %v76_v9 = vmul.f32 %v74_v6, %v74_v6 }
  0x9c   :  { %v75_v10 = vsub.f32 %v61_v1, %v73_v8  ;;  %v78_v11 = vsel %vm64_vm0, %v76_v9, 0.0 }
  0x9d   :  { %79 = vadd.xlane.f32.xlu1 %v78_v11 }
  0x9e   :  { %v77_v12 = vmul.f32 %v75_v10, %v75_v10 }
  0xa0   :  { %v81_v13 = vsel %vm64_vm0, %v77_v12, 0.0 }
  0xa1   :  { %82 = vadd.xlane.f32.xlu1 %v81_v13 }
 0x126   :  { %v80_v17 = vpop.xlane.xlu1 %79 }
 0x127   :  { %v84_v18 = vmul.f32 0.03125, %v80_v17 }
 0x129   :  { %v86_v19 = vadd.f32 1e-12, %v84_v18 }
 0x12a   :  { %v83_v20 = vpop.xlane.xlu1 %82 }
 0x12b   :  { %3626 = vrsqrt.f32 %v86_v19  ;;  %v85_v21 = vmul.f32 0.03125, %v83_v20 }
 0x12d   :  { %v87_v22 = vadd.f32 1e-12, %v85_v21 }
 0x12f   :  { %3628 = vrsqrt.f32 %v87_v22 }
 0x138   :  { %v3627_v23 = vpop.eup %3626 }
 0x139   :  { %v90_v24 = vmul.f32 %v3627_v23, %v74_v6 }
 0x13b   :  { %v98_v28 = vmul.f32 %v3074_v25, %v90_v24 }
 0x13c   :  { %v3629_v26 = vpop.eup %3628 }
 0x13d   :  { %v91_v27 = vmul.f32 %v3629_v26, %v75_v10  ;;  %v3860_v31 = vadd.f32 %v3075_v29, %v98_v28 }
 0x13f   :  { %v99_v30 = vmul.f32 %v3074_v25, %v91_v27 }
 0x141   :  { %v3862_v32 = vadd.f32 %v3075_v29, %v99_v30 }
 0x143   :  { %v118_v33 = vpack.c.bf16 %v3862_v32, %v3860_v31 }
 0x145   :  { %3296 = vmatmul.mubr.msk.bf16.vlgmr.msra.gmra.mxu0 %vm64_vm0, %v118_v33 }
 0x146   :  { %3307 = vmatprep.mubr.msk.bf16.mxu0 %vm3723_vm1, %v3722_v14 }
 0x205   :  { %v175_v35 = vpop.f32.mrf.mxu0 }
 0x206   :  { %v176_v36 = vadd.f32 %v3076_v34, %v175_v35 }
 0x207   :  { %v3297_v37 = vpop.f32.mrf.mxu0 }
 0x208   :  { %v3872_v38 = vpack.c.bf16 %v176_v36, %v176_v36 }
 0x209   :  { %v178_v39 = vpop.f32.mrf.mxu0 }
 0x20a   :  { %v179_v40 = vadd.f32 %v3076_v34, %v178_v39  ;;  %185 = vrot.lane.b32.xlu0 %v3872_v38, %s3724_s3 }
 0x20b   :  { %v3298_v41 = vpop.f32.mrf.mxu0 }
 0x20c   :  { %v3876_v42 = vpack.c.bf16 %v179_v40, %v179_v40 }
 0x20e   :  { %235 = vrot.lane.b32.xlu1 %v3876_v42, %s3724_s3 }
 0x27c   :  { %v186_v43 = vpop.permute.xlu0 %185 }
 0x27d   :  { %v192_v44 = vsel %vm187_vm2, %v186_v43, 0 }
 0x27e   :  { %3300 = vmatpush3.bf16.xpose.msra.mxu1 %v192_v44 }
 0x27f   :  { %3311 = vmatprep.subr.bf16.mxu1 %v3722_v14 }
 0x280   :  { %v236_v45 = vpop.permute.xlu1 %235 }
 0x281   :  { %v241_v46 = vsel %vm187_vm2, %v236_v45, 0 }
 0x282   :  { %3306 = vmatpush3.bf16.xpose.msra.mxu0 %v241_v46 }
 0x283   :  { %3317 = vmatprep.subr.bf16.mxu0 %v3722_v14 }
 0x285   :  { %3302 = vmatmul.mubr.msk.bf16.vlgmr.msra.gmra.mxu1 %vm187_vm2, %v3872_v38 }
 0x286   :  { %3313 = vmatprep.mubr.msk.bf16.mxu1 %vm3723_vm1, %v3722_v14 }
 0x289   :  { %3308 = vmatmul.mubr.msk.bf16.vlgmr.msra.gmra.mxu0 %vm187_vm2, %v3876_v42 }
 0x28a   :  { %3319 = vmatprep.mubr.msk.bf16.mxu0 %vm3723_vm1, %v3722_v14 }
 0x345   :  { %v228_v47 = vpop.f32.mrf.mxu1 }
 0x346   :  { %v283_v49 = vmul.f32 0.35355338, %v228_v47 }
 0x347   :  { %v3303_v50 = vpop.f32.mrf.mxu1 }
 0x348   :  { %v285_v51 = vadd.f32 %v283_v49, %v3895_v48 }
 0x349   :  { %v231_v52 = vpop.f32.mrf.mxu1  ;;  %v277_v53 = vpop.f32.mrf.mxu0 }
 0x34a   :  { %v284_v55 = vmul.f32 0.35355338, %v277_v53  ;;  %v287_v56 = vsel %vm187_vm2, %v285_v51, -inf }
 0x34b   :  { %v3304_v57 = vpop.f32.mrf.mxu1  ;;  %288 = vmax.xlane.f32.xlu1 %v287_v56  ;;  %v3309_v58 = vpop.f32.mrf.mxu0 }
 0x34c   :  { %v286_v59 = vadd.f32 %v284_v55, %v3901_v54 }
 0x34d   :  { %v280_v60 = vpop.f32.mrf.mxu0 }
 0x34e   :  { %v290_v61 = vsel %vm187_vm2, %v286_v59, -inf }
 0x34f   :  { %291 = vmax.xlane.f32.xlu0 %v290_v61  ;;  %v3310_v62 = vpop.f32.mrf.mxu0 }
 0x35c   :  { %360 = vrot.lane.b32.xlu1 %v3876_v42, %s3725_s4 }
 0x360   :  { %411 = vrot.lane.b32.xlu1 %v3872_v38, %s3726_s21 }
 0x3d4   :  { %v289_v63 = vpop.xlane.xlu1 %288 }
 0x3d5   :  { %v293_v0 = vsub.f32 %v285_v51, %v289_v63 }
 0x3d7   :  { %v295_v1 = vmul.f32 1.442695, %v293_v0 }
 0x3d8   :  { %v361_v2 = vpop.permute.xlu1 %360  ;;  %v292_v3 = vpop.xlane.xlu0 %291 }
 0x3d9   :  { %3630 = vpow2.f32 %v295_v1  ;;  %v366_v4 = vsel %vm316_vm3, %v361_v2, 0  ;;  %v294_v5 = vsub.f32 %v286_v59, %v292_v3 }
 0x3da   :  { %3318 = vmatpush3.bf16.msra.mxu0 %v366_v4 }
 0x3db   :  { %v297_v6 = vmul.f32 1.442695, %v294_v5  ;;  %3329 = vmatprep.subr.bf16.mxu0 %v3722_v14 }
 0x3dc   :  { %v412_v11 = vpop.permute.xlu1 %411 }
 0x3dd   :  { %3632 = vpow2.f32 %v297_v6  ;;  %v417_v21 = vsel %vm187_vm2, %v412_v11, 0 }
 0x3e6   :  { %v3631_v7 = vpop.eup %3630 }
 0x3e7   :  { %v299_v8 = vsel %vm187_vm2, %v3631_v7, 0.0 }
 0x3e8   :  { %300 = vadd.xlane.f32.xlu0 %v299_v8 }
 0x3ea   :  { %v3633_v9 = vpop.eup %3632 }
 0x3eb   :  { %v302_v10 = vsel %vm187_vm2, %v3633_v9, 0.0 }
 0x3ec   :  { %303 = vadd.xlane.f32.xlu1 %v302_v10 }
 0x3fd   :  { %461 = vrot.lane.b32.xlu1 %v3876_v42, %s3726_s21 }
 0x3fe   :  { %311 = vrot.lane.b32.xlu0 %v3872_v38, %s3725_s4 }
 0x401   :  { %459 = vrot.lane.b32.xlu1 %v3876_v42, %s3727_s22 }
 0x402   :  { %409 = vrot.lane.b32.xlu0 %v3872_v38, %s3727_s22 }
 0x471   :  { %v301_v12 = vpop.xlane.xlu0 %300 }
 0x472   :  { %3634 = vrcp.f32 %v301_v12 }
 0x475   :  { %v304_v13 = vpop.xlane.xlu1 %303  ;;  %v312_v15 = vpop.permute.xlu0 %311 }
 0x476   :  { %3636 = vrcp.f32 %v304_v13  ;;  %v318_v16 = vsel %vm316_vm3, %v312_v15, 0  ;;  %v114_v13 = vld [vmem:[%s4471_s6] sm:$0xf] }
 0x477   :  { %3312 = vmatpush3.bf16.msra.mxu1 %v318_v16 }
 0x478   :  { %3323 = vmatprep.subr.bf16.mxu1 %v3722_v14 }
 0x479   :  { %v462_v23 = vpop.permute.xlu1 %461  ;;  %v410_v26 = vpop.permute.xlu0 %409 }
 0x47a   :  { %v467_v25 = vsel %vm187_vm2, %v462_v23, 0 }
 0x47d   :  { %v460_v27 = vpop.permute.xlu1 %459 }
 0x47f   :  { %v3635_v17 = vpop.eup %3634 }
 0x480   :  { %v307_v18 = vmul.f32 %v3635_v17, %v3631_v7  ;;  %v685_v17 = vsel %vm316_vm3, %v114_v13, 0 }
 0x482   :  { %v309_v19 = vpack.c.bf16 %v307_v18, %v307_v18 }
 0x483   :  { %v3637_v20 = vpop.eup %3636 }
 0x484   :  { %3314 = vmatmul.mubr.msk.bf16.vlgmr.msra.gmra.mxu1 %vm187_vm2, %v309_v19  ;;  %v308_v22 = vmul.f32 %v3637_v20, %v3633_v9 }
 0x485   :  { %3324 = vmatpush3.bf16.xpose.msra.mxu1 %v417_v21  ;;  %3325 = vmatprep.mubr.msk.bf16.mxu1 %vm3723_vm1, %v3722_v14 }
 0x486   :  { %v310_v24 = vpack.c.bf16 %v308_v22, %v308_v22  ;;  %3335 = vmatprep.subr.bf16.mxu1 %v3722_v14  ;;  %v115_v22 = vld [vmem:[%s4471_s6 + $0x4] sm:$0xf] }
 0x487   :  { %v638_v23 = vsel %vm316_vm3, %v115_v22, 0 }
 0x488   :  { %3320 = vmatmul.mubr.msk.bf16.vlgmr.msra.gmra.mxu0 %vm187_vm2, %v310_v24 }
 0x489   :  { %3330 = vmatpush3.bf16.xpose.msra.mxu0 %v467_v25  ;;  %3331 = vmatprep.mubr.msk.bf16.mxu0 %vm3723_vm1, %v3722_v14 }
 0x48a   :  { %3341 = vmatprep.subr.bf16.mxu0 %v3722_v14 }
 0x48c   :  { %3326 = vmatmul.mubr.msk.bf16.vlgmr.msra.gmra.mxu1 %vm187_vm2, %v410_v26 }
 0x48d   :  { %3337 = vmatprep.mubr.msk.bf16.mxu1 %vm3723_vm1, %v3722_v14 }
 0x490   :  { %3332 = vmatmul.mubr.msk.bf16.vlgmr.msra.gmra.mxu0 %vm187_vm2, %v460_v27 }
 0x491   :  { %3343 = vmatprep.mubr.msk.bf16.mxu0 %vm3723_vm1, %v3722_v14 }
 0x544   :  { %v3940_v28 = vpop.f32.mrf.mxu1 }
 0x546   :  { %v3315_v29 = vpop.f32.mrf.mxu1 }
 0x548   :  { %v357_v30 = vpop.f32.mrf.mxu1  ;;  %v3942_v33 = vpop.f32.mrf.mxu0 }
 0x549   :  { %v408_v34 = vpack.c.bf16 %v3942_v33, %v3940_v28 }
 0x54a   :  { %v3316_v35 = vpop.f32.mrf.mxu1  ;;  %v3321_v36 = vpop.f32.mrf.mxu0 }
 0x54c   :  { %v405_v37 = vpop.f32.mrf.mxu0  ;;  %v453_v39 = vpop.f32.mrf.mxu1 }
 0x54d   :  { %v509_v40 = vmul.f32 0.35355338, %v453_v39 }
 0x54e   :  { %v3322_v41 = vpop.f32.mrf.mxu0  ;;  %v3327_v43 = vpop.f32.mrf.mxu1 }
 0x54f   :  { %v511_v44 = vadd.f32 %v509_v40, %v3895_v48 }
 0x550   :  { %v456_v45 = vpop.f32.mrf.mxu1  ;;  %v503_v46 = vpop.f32.mrf.mxu0 }
 0x551   :  { %v510_v47 = vmul.f32 0.35355338, %v503_v46  ;;  %v513_v49 = vsel %vm187_vm2, %v511_v44, -inf }
 0x552   :  { %514 = vmax.xlane.f32.xlu0 %v513_v49  ;;  %v3328_v50 = vpop.f32.mrf.mxu1  ;;  %v3333_v51 = vpop.f32.mrf.mxu0 }
 0x553   :  { %v512_v52 = vadd.f32 %v510_v47, %v3901_v54 }
 0x554   :  { %v506_v53 = vpop.f32.mrf.mxu0 }
 0x555   :  { %v516_v55 = vsel %vm187_vm2, %v512_v52, -inf }
 0x556   :  { %517 = vmax.xlane.f32.xlu1 %v516_v55  ;;  %v3334_v56 = vpop.f32.mrf.mxu0 }
 0x567   :  { %585 = vrot.lane.b32.xlu1 %v3876_v42, %s3728_s2 }
 0x56b   :  { %730 = vrot.lane.b32.xlu1 %v3872_v38, %s3729_s23 }
 0x56f   :  { %780 = vrot.lane.b32.xlu1 %v3876_v42, %s3729_s23 }
 0x573   :  { %778 = vrot.lane.b32.xlu1 %v3876_v42, %s3730_s24 }
 0x5db   :  { %v515_v57 = vpop.xlane.xlu0 %514 }
 0x5dc   :  { %v519_v58 = vsub.f32 %v511_v44, %v515_v57 }
 0x5de   :  { %v521_v59 = vmul.f32 1.442695, %v519_v58 }
 0x5df   :  { %v518_v60 = vpop.xlane.xlu1 %517 }
 0x5e0   :  { %3638 = vpow2.f32 %v521_v59  ;;  %v520_v61 = vsub.f32 %v512_v52, %v518_v60 }
 0x5e2   :  { %v523_v62 = vmul.f32 1.442695, %v520_v61 }
 0x5e3   :  { %v586_v63 = vpop.permute.xlu1 %585 }
 0x5e4   :  { %3640 = vpow2.f32 %v523_v62  ;;  %v591_v0 = vsel %vm316_vm3, %v586_v63, 0 }
 0x5e5   :  { %3342 = vmatpush3.bf16.msra.mxu0 %v591_v0 }
 0x5e6   :  { %3353 = vmatprep.subr.bf16.mxu0 %v3722_v14 }
 0x5e7   :  { %v731_v18 = vpop.permute.xlu1 %730 }
 0x5e8   :  { %v736_v33 = vsel %vm187_vm2, %v731_v18, 0 }
 0x5eb   :  { %v781_v19 = vpop.permute.xlu1 %780 }
 0x5ec   :  { %v786_v20 = vsel %vm187_vm2, %v781_v19, 0 }
 0x5ed   :  { %v3639_v1 = vpop.eup %3638 }
 0x5ee   :  { %v525_v2 = vsel %vm187_vm2, %v3639_v1, 0.0 }
 0x5ef   :  { %526 = vadd.xlane.f32.xlu0 %v525_v2  ;;  %v779_v21 = vpop.permute.xlu1 %778 }
 0x5f1   :  { %v3641_v3 = vpop.eup %3640 }
 0x5f2   :  { %v528_v4 = vsel %vm187_vm2, %v3641_v3, 0.0 }
 0x5f3   :  { %529 = vadd.xlane.f32.xlu0 %v528_v4 }
 0x609   :  { %537 = vrot.lane.b32.xlu0 %v3872_v38, %s3728_s2 }
 0x60d   :  { %728 = vrot.lane.b32.xlu0 %v3872_v38, %s3730_s24 }
 0x678   :  { %v527_v5 = vpop.xlane.xlu0 %526 }
 0x679   :  { %3642 = vrcp.f32 %v527_v5 }
 0x67c   :  { %v530_v6 = vpop.xlane.xlu0 %529 }
 0x67d   :  { %3644 = vrcp.f32 %v530_v6 }
 0x680   :  { %v538_v7 = vpop.permute.xlu0 %537 }
 0x681   :  { %v543_v8 = vsel %vm316_vm3, %v538_v7, 0 }
 0x682   :  { %3336 = vmatpush3.bf16.msra.mxu1 %v543_v8 }
 0x683   :  { %3347 = vmatprep.subr.bf16.mxu1 %v3722_v14 }
 0x684   :  { %v729_v37 = vpop.permute.xlu0 %728 }
 0x686   :  { %v3643_v9 = vpop.eup %3642 }
 0x687   :  { %v533_v10 = vmul.f32 %v3643_v9, %v3639_v1 }
 0x689   :  { %v535_v11 = vpack.c.bf16 %v533_v10, %v533_v10 }
 0x68a   :  { %v3645_v12 = vpop.eup %3644 }
 0x68b   :  { %3338 = vmatmul.mubr.msk.bf16.vlgmr.msra.gmra.mxu1 %vm187_vm2, %v535_v11  ;;  %v534_v15 = vmul.f32 %v3645_v12, %v3641_v3 }
 0x68c   :  { %3349 = vmatprep.mubr.msk.bf16.mxu1 %vm3723_vm1, %v3722_v14  ;;  %3348 = vmatpush3.bf16.msra.mxu1 %v638_v23 }
 0x68d   :  { %v536_v16 = vpack.c.bf16 %v534_v15, %v534_v15  ;;  %3359 = vmatprep.subr.bf16.mxu1 %v3722_v14 }
 0x68f   :  { %3344 = vmatmul.mubr.msk.bf16.vlgmr.msra.gmra.mxu0 %vm187_vm2, %v536_v16 }
 0x690   :  { %3354 = vmatpush3.bf16.msra.mxu0 %v685_v17  ;;  %3355 = vmatprep.mubr.msk.bf16.mxu0 %vm3723_vm1, %v3722_v14 }
 0x691   :  { %3365 = vmatprep.subr.bf16.mxu0 %v3722_v14 }
 0x697   :  { %3356 = vmatmul.mubr.msk.bf16.vlgmr.msra.gmra.mxu0 %vm187_vm2, %v408_v34 }
 0x698   :  { %3366 = vmatpush3.bf16.xpose.msra.mxu0 %v786_v20  ;;  %3367 = vmatprep.mubr.msk.bf16.mxu0 %vm3723_vm1, %v3722_v14 }
 0x699   :  { %3377 = vmatprep.subr.bf16.mxu0 %v3722_v14 }
 0x69f   :  { %3368 = vmatmul.mubr.msk.bf16.vlgmr.msra.gmra.mxu0 %vm187_vm2, %v779_v21 }
 0x6a0   :  { %3379 = vmatprep.mubr.msk.bf16.mxu0 %vm3723_vm1, %v3722_v14 }
 0x74b   :  { %v579_v24 = vpop.f32.mrf.mxu1 }
 0x74d   :  { %v3339_v25 = vpop.f32.mrf.mxu1 }
 0x74f   :  { %v582_v26 = vpop.f32.mrf.mxu1  ;;  %v627_v27 = vpop.f32.mrf.mxu0 }
 0x750   :  { %v633_v28 = vpack.c.bf16 %v627_v27, %v579_v24 }
 0x751   :  { %v3340_v29 = vpop.f32.mrf.mxu1  ;;  %v3345_v30 = vpop.f32.mrf.mxu0 }
 0x752   :  { %3350 = vmatmul.mubr.msk.bf16.vlgmr.msra.gmra.mxu1 %vm187_vm2, %v633_v28  ;;  %v116_v29 = vld [vmem:[%s4471_s6 + $0x8] sm:$0xf] }
 0x753   :  { %3360 = vmatpush3.bf16.xpose.msra.mxu1 %v736_v33  ;;  %v630_v34 = vpop.f32.mrf.mxu0  ;;  %3361 = vmatprep.mubr.msk.bf16.mxu1 %vm3723_vm1, %v3722_v14  ;;  %v957_v30 = vsel %vm316_vm3, %v116_v29, 0 }
 0x754   :  { %3371 = vmatprep.subr.bf16.mxu1 %v3722_v14 }
 0x755   :  { %v3346_v35 = vpop.f32.mrf.mxu0 }
 0x757   :  { %v4000_v36 = vpop.f32.mrf.mxu0 }
 0x759   :  { %v3357_v39 = vpop.f32.mrf.mxu0 }
 0x75a   :  { %3362 = vmatmul.mubr.msk.bf16.vlgmr.msra.gmra.mxu1 %vm187_vm2, %v729_v37 }
 0x75b   :  { %v4003_v40 = vpop.f32.mrf.mxu0  ;;  %3373 = vmatprep.mubr.msk.bf16.mxu1 %vm3723_vm1, %v3722_v14 }
 0x75d   :  { %v3358_v41 = vpop.f32.mrf.mxu0 }
 0x75f   :  { %v822_v43 = vpop.f32.mrf.mxu0 }
 0x760   :  { %v829_v44 = vmul.f32 0.35355338, %v822_v43 }
 0x761   :  { %v3369_v45 = vpop.f32.mrf.mxu0 }
 0x762   :  { %v831_v46 = vadd.f32 %v829_v44, %v3901_v54 }
 0x763   :  { %v825_v47 = vpop.f32.mrf.mxu0 }
 0x764   :  { %v835_v49 = vsel %vm187_vm2, %v831_v46, -inf }
 0x765   :  { %836 = vmax.xlane.f32.xlu1 %v835_v49  ;;  %v3370_v50 = vpop.f32.mrf.mxu0 }
 0x776   :  { %904 = vrot.lane.b32.xlu1 %v3876_v42, %s3731_s29 }
 0x77a   :  { %1004 = vrot.lane.b32.xlu1 %v3872_v38, %s4490_s30 }
 0x77e   :  { %1054 = vrot.lane.b32.xlu1 %v3876_v42, %s4490_s30 }
 0x782   :  { %1052 = vrot.lane.b32.xlu1 %v3876_v42, %s4488_s0 }
 0x7ee   :  { %v837_v51 = vpop.xlane.xlu1 %836 }
 0x7ef   :  { %v839_v55 = vsub.f32 %v831_v46, %v837_v51 }
 0x7f1   :  { %v842_v56 = vmul.f32 1.442695, %v839_v55 }
 0x7f2   :  { %v905_v52 = vpop.permute.xlu1 %904 }
 0x7f3   :  { %v910_v53 = vsel %vm316_vm3, %v905_v52, 0  ;;  %3646 = vpow2.f32 %v842_v56 }
 0x7f4   :  { %3378 = vmatpush3.bf16.msra.mxu0 %v910_v53 }
 0x7f5   :  { %3389 = vmatprep.subr.bf16.mxu0 %v3722_v14 }
 0x7f6   :  { %v1005_v15 = vpop.permute.xlu1 %1004 }
 0x7f7   :  { %v1010_v17 = vsel %vm187_vm2, %v1005_v15, 0 }
 0x7fa   :  { %v1055_v44 = vpop.permute.xlu1 %1054 }
 0x7fb   :  { %v1060_v49 = vsel %vm187_vm2, %v1055_v44, 0 }
 0x7fe   :  { %v1053_v51 = vpop.permute.xlu1 %1052 }
 0x800   :  { %v3647_v3 = vpop.eup %3646 }
 0x801   :  { %v847_v5 = vsel %vm187_vm2, %v3647_v3, 0.0 }
 0x812   :  { %v4019_v57 = vpop.f32.mrf.mxu1 }
 0x814   :  { %v3351_v58 = vpop.f32.mrf.mxu1 }
 0x816   :  { %v4021_v59 = vpop.f32.mrf.mxu1 }
 0x818   :  { %v3352_v60 = vpop.f32.mrf.mxu1 }
 0x819   :  { %v722_v60 = vadd.f32 %v4000_v36, %v4019_v57 }
 0x81a   :  { %v772_v61 = vpop.f32.mrf.mxu1 }
 0x81b   :  { %v828_v62 = vmul.f32 0.35355338, %v772_v61 }
 0x81c   :  { %v3363_v63 = vpop.f32.mrf.mxu1 }
 0x81d   :  { %v830_v0 = vadd.f32 %v828_v62, %v3895_v48 }
 0x81e   :  { %v775_v1 = vpop.f32.mrf.mxu1 }
 0x81f   :  { %v832_v2 = vsel %vm187_vm2, %v830_v0, -inf }
 0x820   :  { %833 = vmax.xlane.f32.xlu0 %v832_v2  ;;  %v3364_v4 = vpop.f32.mrf.mxu1 }
 0x824   :  { %848 = vadd.xlane.f32.xlu0 %v847_v5 }
 0x8a9   :  { %v834_v6 = vpop.xlane.xlu0 %833 }
 0x8aa   :  { %v838_v7 = vsub.f32 %v830_v0, %v834_v6  ;;  %v725_v0 = vadd.f32 %v4003_v40, %v4021_v59 }
 0x8ac   :  { %v840_v8 = vmul.f32 1.442695, %v838_v7 }
 0x8ad   :  { %v849_v9 = vpop.xlane.xlu0 %848 }
 0x8ae   :  { %3648 = vpow2.f32 %v840_v8 }
 0x8af   :  { %3650 = vrcp.f32 %v849_v9 }
 0x8bb   :  { %v3649_v10 = vpop.eup %3648 }
 0x8bc   :  { %v3651_v11 = vpop.eup %3650  ;;  %v844_v12 = vsel %vm187_vm2, %v3649_v10, 0.0 }
 0x8bd   :  { %845 = vadd.xlane.f32.xlu0 %v844_v12  ;;  %v853_v13 = vmul.f32 %v3651_v11, %v3647_v3 }
 0x8bf   :  { %v855_v16 = vpack.c.bf16 %v853_v13, %v853_v13 }
 0x8c1   :  { %3380 = vmatmul.mubr.msk.bf16.vlgmr.msra.gmra.mxu0 %vm187_vm2, %v855_v16 }
 0x8c2   :  { %3390 = vmatpush3.bf16.xpose.msra.mxu0 %v1010_v17  ;;  %3391 = vmatprep.mubr.msk.bf16.mxu0 %vm3723_vm1, %v3722_v14 }
 0x8c3   :  { %3401 = vmatprep.subr.bf16.mxu0 %v3722_v14 }
 0x8d3   :  { %856 = vrot.lane.b32.xlu0 %v3872_v38, %s3731_s29 }
 0x8d7   :  { %1002 = vrot.lane.b32.xlu0 %v3872_v38, %s4488_s0 }
 0x946   :  { %v846_v18 = vpop.xlane.xlu0 %845 }
 0x947   :  { %3652 = vrcp.f32 %v846_v18 }
 0x94a   :  { %v857_v19 = vpop.permute.xlu0 %856 }
 0x94b   :  { %v862_v20 = vsel %vm316_vm3, %v857_v19, 0 }
 0x94c   :  { %3372 = vmatpush3.bf16.msra.mxu1 %v862_v20 }
 0x94d   :  { %3383 = vmatprep.subr.bf16.mxu1 %v3722_v14 }
 0x94e   :  { %v1003_v21 = vpop.permute.xlu0 %1002 }
 0x94f   :  { %3392 = vmatmul.mubr.msk.bf16.vlgmr.msra.gmra.mxu0 %vm187_vm2, %v1003_v21 }
 0x950   :  { %3403 = vmatprep.mubr.msk.bf16.mxu0 %vm3723_vm1, %v3722_v14 }
 0x954   :  { %v3653_v22 = vpop.eup %3652 }
 0x955   :  { %v852_v23 = vmul.f32 %v3653_v22, %v3649_v10  ;;  %v117_v22 = vld [vmem:[%s4471_s6 + $0xc] sm:$0xf] }
 0x957   :  { %v854_v24 = vpack.c.bf16 %v852_v23, %v852_v23  ;;  %v1231_v23 = vsel %vm316_vm3, %v117_v22, 0 }
 0x959   :  { %3374 = vmatmul.mubr.msk.bf16.vlgmr.msra.gmra.mxu1 %vm187_vm2, %v854_v24 }
 0x95a   :  { %3385 = vmatprep.mubr.msk.bf16.mxu1 %vm3723_vm1, %v3722_v14  ;;  %3384 = vmatpush3.bf16.msra.mxu1 %v957_v30 }
 0x95b   :  { %3395 = vmatprep.subr.bf16.mxu1 %v3722_v14 }
 0x981   :  { %v946_v25 = vpop.f32.mrf.mxu0 }
 0x983   :  { %v3381_v26 = vpop.f32.mrf.mxu0 }
 0x985   :  { %v949_v27 = vpop.f32.mrf.mxu0 }
 0x987   :  { %v3382_v28 = vpop.f32.mrf.mxu0 }
 0xa0f   :  { %v1046_v33 = vpop.f32.mrf.mxu0 }
 0xa10   :  { %v1102_v34 = vmul.f32 0.35355338, %v1046_v33 }
 0xa11   :  { %v3393_v35 = vpop.f32.mrf.mxu0 }
 0xa12   :  { %v1104_v37 = vadd.f32 %v1102_v34, %v3895_v48 }
 0xa13   :  { %v1049_v39 = vpop.f32.mrf.mxu0 }
 0xa14   :  { %v1106_v41 = vsel %vm187_vm2, %v1104_v37, -inf }
 0xa15   :  { %1107 = vmax.xlane.f32.xlu0 %v1106_v41  ;;  %v3394_v43 = vpop.f32.mrf.mxu0 }
 0xa19   :  { %v898_v45 = vpop.f32.mrf.mxu1 }
 0xa1a   :  { %v952_v46 = vpack.c.bf16 %v946_v25, %v898_v45 }
 0xa1b   :  { %v3375_v47 = vpop.f32.mrf.mxu1 }
 0xa1c   :  { %3386 = vmatmul.mubr.msk.bf16.vlgmr.msra.gmra.mxu1 %vm187_vm2, %v952_v46 }
 0xa1d   :  { %3396 = vmatpush3.bf16.xpose.msra.mxu1 %v1060_v49  ;;  %v901_v50 = vpop.f32.mrf.mxu1  ;;  %3397 = vmatprep.mubr.msk.bf16.mxu1 %vm3723_vm1, %v3722_v14 }
 0xa1e   :  { %3407 = vmatprep.subr.bf16.mxu1 %v3722_v14 }
 0xa1f   :  { %v3376_v48 = vpop.f32.mrf.mxu1 }
 0xa24   :  { %3398 = vmatmul.mubr.msk.bf16.vlgmr.msra.gmra.mxu1 %vm187_vm2, %v1053_v51 }
 0xa25   :  { %3409 = vmatprep.mubr.msk.bf16.mxu1 %vm3723_vm1, %v3722_v14 }
 0xa9e   :  { %v1108_v52 = vpop.xlane.xlu0 %1107 }
 0xa9f   :  { %v1112_v53 = vsub.f32 %v1104_v37, %v1108_v52  ;;  %v3100_v37 = vld [vmem:[%s4472_s7] ss:$0 sm:$0xff] }
 0xaa1   :  { %v1114_v55 = vmul.f32 1.442695, %v1112_v53 }
 0xaa3   :  { %3654 = vpow2.f32 %v1114_v55 }
 0xab0   :  { %v3655_v56 = vpop.eup %3654 }
 0xab1   :  { %v1118_v58 = vsel %vm187_vm2, %v3655_v56, 0.0 }
 0xab2   :  { %1119 = vadd.xlane.f32.xlu0 %v1118_v58 }
 0xadc   :  { %v993_v61 = vpop.f32.mrf.mxu1 }
 0xadd   :  { %v4062_v62 = vadd.f32 %v993_v61, %v722_v60 }
 0xade   :  { %v3387_v63 = vpop.f32.mrf.mxu1 }
 0xae0   :  { %v996_v1 = vpop.f32.mrf.mxu1 }
 0xae1   :  { %v4066_v2 = vadd.f32 %v996_v1, %v725_v0  ;;  %v3611_v0 = vld [vmem:[%s4473_s10] sm:$0xff]  }
 0xae2   :  { %v3388_v3 = vpop.f32.mrf.mxu1 }
 0xae4   :  { %v1096_v4 = vpop.f32.mrf.mxu1 }
 0xae5   :  { %v1103_v5 = vmul.f32 0.35355338, %v1096_v4 }
 0xae6   :  { %v3399_v6 = vpop.f32.mrf.mxu1 }
 0xae7   :  { %v1105_v7 = vadd.f32 %v1103_v5, %v3901_v54 }
 0xae8   :  { %v1099_v8 = vpop.f32.mrf.mxu1 }
 0xae9   :  { %v1109_v9 = vsel %vm187_vm2, %v1105_v7, -inf }
 0xaea   :  { %1110 = vmax.xlane.f32.xlu1 %v1109_v9  ;;  %v3400_v36 = vpop.f32.mrf.mxu1  ;;  %v3101_v9 = vld [vmem:[%s4474_s8] ss:$0 sm:$0xff] }
 0xafb   :  { %1178 = vrot.lane.b32.xlu1 %v3876_v42, %s4486_s26 }
 0xb3b   :  { %v1120_v13 = vpop.xlane.xlu0 %1119 }
 0xb73   :  { %v1111_v57 = vpop.xlane.xlu1 %1110 }
 0xb74   :  { %v1113_v40 = vsub.f32 %v1105_v7, %v1111_v57 }
 0xb76   :  { %v1116_v59 = vmul.f32 1.442695, %v1113_v40 }
 0xb77   :  { %v1179_v10 = vpop.permute.xlu1 %1178 }
 0xb78   :  { %3656 = vpow2.f32 %v1116_v59  ;;  %v1184_v11 = vsel %vm316_vm3, %v1179_v10, 0  ;;  %v3102_v59 = vld [vmem:[%s4475_s9] ss:$0 sm:$0xff] }
 0xb79   :  { %3408 = vmatpush3.bf16.msra.mxu1 %v1184_v11  ;;  %3658 = vrcp.f32 %v1120_v13  ;;  %v3612_v13 = vld [vmem:[%s4476_s12 + $0x18] sm:$0xff]  }
 0xb7a   :  { %3419 = vmatprep.subr.bf16.mxu1 %v3722_v14 }
 0xb85   :  { %v3657_v54 = vpop.eup %3656 }
 0xb86   :  { %v1121_v12 = vsel %vm187_vm2, %v3657_v54, 0.0  ;;  %v3659_v42 = vpop.eup %3658 }
 0xb87   :  { %1122 = vadd.xlane.f32.xlu0 %v1121_v12  ;;  %v1126_v16 = vmul.f32 %v3659_v42, %v3655_v56  ;;  %v3613_v42 = vld [vmem:[%s4476_s12 + $0x10] sm:$0xff]  }
 0xb89   :  { %v1128_v19 = vpack.c.bf16 %v1126_v16, %v1126_v16  ;;  %v3615_v16 = vld [vmem:[%s4476_s12] sm:$0xff]  }
 0xb9d   :  { %1130 = vrot.lane.b32.xlu0 %v3872_v38, %s4486_s26 }
 0xc10   :  { %v1123_v15 = vpop.xlane.xlu0 %1122 }
 0xc11   :  { %3660 = vrcp.f32 %v1123_v15  ;;  %v3614_v15 = vld [vmem:[%s4476_s12 + $0x8] sm:$0xff]  }
 0xc14   :  { %v1131_v17 = vpop.permute.xlu0 %1130 }
 0xc15   :  { %v1136_v18 = vsel %vm316_vm3, %v1131_v17, 0  ;;  %v3103_v17 = vld [vmem:[%s4477_s11] ss:$0 sm:$0xff] }
 0xc16   :  { %3402 = vmatpush3.bf16.msra.mxu0 %v1136_v18 }
 0xc17   :  { %3413 = vmatprep.subr.bf16.mxu0 %v3722_v14 }
 0xc19   :  { %3404 = vmatmul.mubr.msk.bf16.vlgmr.msra.gmra.mxu0 %vm187_vm2, %v1128_v19 }
 0xc1a   :  { %3415 = vmatprep.mubr.msk.bf16.mxu0 %vm3723_vm1, %v3722_v14  ;;  %3414 = vmatpush3.bf16.msra.mxu0 %v1231_v23 }
 0xc1b   :  { %3427 = vmatprep.subr.bf16.mxu0 %v3722_v14 }
 0xc1e   :  { %v3661_v20 = vpop.eup %3660 }
 0xc1f   :  { %v1127_v38 = vmul.f32 %v3661_v20, %v3657_v54 }
 0xc21   :  { %v1129_v21 = vpack.c.bf16 %v1127_v38, %v1127_v38 }
 0xc23   :  { %3410 = vmatmul.mubr.msk.bf16.vlgmr.msra.gmra.mxu1 %vm187_vm2, %v1129_v21 }
 0xc24   :  { %3423 = vmatprep.mubr.msk.bf16.mxu1 %vm3723_vm1, %v3722_v14 }
 0xcd9   :  { %v1172_v24 = vpop.f32.mrf.mxu0 }
 0xcdb   :  { %v3405_v25 = vpop.f32.mrf.mxu0 }
 0xcdd   :  { %v1175_v26 = vpop.f32.mrf.mxu0 }
 0xcdf   :  { %v3406_v27 = vpop.f32.mrf.mxu0 }
 0xce3   :  { %v1220_v28 = vpop.f32.mrf.mxu1 }
 0xce4   :  { %v1226_v29 = vpack.c.bf16 %v1220_v28, %v1172_v24 }
 0xce5   :  { %v3411_v30 = vpop.f32.mrf.mxu1 }
 0xce6   :  { %3416 = vmatmul.mubr.msk.bf16.vlgmr.msra.gmra.mxu0 %vm187_vm2, %v1226_v29 }
 0xce7   :  { %v1223_v33 = vpop.f32.mrf.mxu1  ;;  %3435 = vmatprep.mubr.msk.bf16.mxu0 %vm3723_vm1, %v3722_v14  ;;  %3428 = vmatpush3.bf16.msra.mxu0 %v3612_v13 }
 0xce8   :  { %3429 = vmatprep.subr.bf16.mxu0 %v3722_v14 }
 0xce9   :  { %v3412_v34 = vpop.f32.mrf.mxu1 }
 0xceb   :  { %3430 = vmatpush3.bf16.msra.mxu0 %v3613_v42 }
 0xcec   :  { %3431 = vmatprep.subr.bf16.mxu0 %v3722_v14 }
 0xcef   :  { %3432 = vmatpush3.bf16.msra.mxu0 %v3614_v15  ;;  %v3114_v15 = vld [vmem:[%s4480_s15] ss:$0 sm:$0xff] }
 0xcf0   :  { %3433 = vmatprep.subr.bf16.mxu0 %v3722_v14 }
 0xcf3   :  { %3434 = vmatpush3.bf16.msra.mxu0 %v3615_v16 }
 0xcf4   :  { %3453 = vmatprep.subr.bf16.mxu0 %v3722_v14 }
 0xda6   :  { %v1267_v35 = vpop.f32.mrf.mxu0 }
 0xda7   :  { %v1274_v39 = vadd.f32 %v1267_v35, %v4062_v62 }
 0xda8   :  { %v3417_v41 = vpop.f32.mrf.mxu0 }
 0xda9   :  { %v1283_v43 = vadd.f32 %v3100_v37, %v1274_v39 }
 0xdaa   :  { %v1270_v44 = vpop.f32.mrf.mxu0 }
 0xdab   :  { %v1275_v45 = vadd.f32 %v1270_v44, %v4066_v2  ;;  %v1285_v46 = vadd.f32 %v1283_v43, %v3860_v31 }
 0xdac   :  { %v3418_v47 = vpop.f32.mrf.mxu0 }
 0xdad   :  { %v1284_v49 = vadd.f32 %v3100_v37, %v1275_v45  ;;  %v1289_v50 = vsel %vm64_vm0, %v1285_v46, 0.0 }
 0xdae   :  { %1290 = vadd.xlane.f32.xlu1 %v1289_v50 }
 0xdaf   :  { %v1286_v48 = vadd.f32 %v1284_v49, %v3862_v32  ;;  %v3610_v32 = vld [vmem:[%s4473_s10 + $0x8] sm:$0xff]   ;;  %v3107_v49 = vld [vmem:[%s4478_s13] ss:$0 sm:$0xff] }
 0xdb0   :  { %3420 = vmatpush3.bf16.msra.mxu1 %v3610_v32 }
 0xdb1   :  { %v1292_v51 = vsel %vm64_vm0, %v1286_v48, 0.0  ;;  %3421 = vmatprep.subr.bf16.mxu1 %v3722_v14 }
 0xdb2   :  { %1293 = vadd.xlane.f32.xlu0 %v1292_v51 }
 0xdb4   :  { %3422 = vmatpush3.bf16.msra.mxu1 %v3611_v0 }
 0xdb5   :  { %3439 = vmatprep.subr.bf16.mxu1 %v3722_v14 }
 0xe37   :  { %v1291_v52 = vpop.xlane.xlu1 %1290 }
 0xe38   :  { %v1295_v53 = vmul.f32 0.03125, %v1291_v52 }
 0xe3a   :  { %v1297_v55 = vsub.f32 %v1285_v46, %v1295_v53 }
 0xe3b   :  { %v1294_v56 = vpop.xlane.xlu0 %1293 }
 0xe3c   :  { %v1296_v58 = vmul.f32 0.03125, %v1294_v56  ;;  %v1299_v60 = vmul.f32 %v1297_v55, %v1297_v55 }
 0xe3e   :  { %v1298_v61 = vsub.f32 %v1286_v48, %v1296_v58  ;;  %v1301_v62 = vsel %vm64_vm0, %v1299_v60, 0.0 }
 0xe3f   :  { %1302 = vadd.xlane.f32.xlu0 %v1301_v62 }
 0xe40   :  { %v1300_v31 = vmul.f32 %v1298_v61, %v1298_v61 }
 0xe42   :  { %v1304_v63 = vsel %vm64_vm0, %v1300_v31, 0.0 }
 0xe43   :  { %1305 = vadd.xlane.f32.xlu1 %v1304_v63 }
 0xec8   :  { %v1303_v1 = vpop.xlane.xlu0 %1302 }
 0xec9   :  { %v1307_v2 = vmul.f32 0.03125, %v1303_v1 }
 0xecb   :  { %v1309_v3 = vadd.f32 1e-12, %v1307_v2 }
 0xecc   :  { %v1306_v4 = vpop.xlane.xlu1 %1305 }
 0xecd   :  { %3662 = vrsqrt.f32 %v1309_v3  ;;  %v1308_v5 = vmul.f32 0.03125, %v1306_v4 }
 0xecf   :  { %v1310_v6 = vadd.f32 1e-12, %v1308_v5 }
 0xed1   :  { %3664 = vrsqrt.f32 %v1310_v6  ;;  %v3616_v6 = vld [vmem:[%s4496_s20 + $0x18] sm:$0xff]  }
 0xeda   :  { %v3663_v7 = vpop.eup %3662 }
 0xedb   :  { %v1313_v8 = vmul.f32 %v3663_v7, %v1297_v55  ;;  %v3617_v7 = vld [vmem:[%s4496_s20 + $0x10] sm:$0xff]  }
 0xedd   :  { %v1321_v40 = vmul.f32 %v3101_v9, %v1313_v8 }
 0xede   :  { %v3665_v36 = vpop.eup %3664 }
 0xedf   :  { %v1314_v57 = vmul.f32 %v3665_v36, %v1298_v61  ;;  %v1329_v11 = vadd.f32 %v3102_v59, %v1321_v40 }
 0xee1   :  { %v1322_v10 = vmul.f32 %v3101_v9, %v1314_v57 }
 0xee3   :  { %v1330_v54 = vadd.f32 %v3102_v59, %v1322_v10 }
 0xee5   :  { %v1331_v12 = vpack.c.bf16 %v1330_v54, %v1329_v11 }
 0xee7   :  { %3424 = vmatmul.mubr.msk.bf16.vlgmr.msra.gmra.mxu1 %vm64_vm0, %v1331_v12 }
 0xee8   :  { %3443 = vmatprep.mubr.msk.bf16.mxu1 %vm3723_vm1, %v3722_v14  ;;  %3440 = vmatpush3.bf16.msra.mxu1 %v3616_v6 }
 0xee9   :  { %3441 = vmatprep.subr.bf16.mxu1 %v3722_v14 }
 0xeec   :  { %3442 = vmatpush3.bf16.msra.mxu1 %v3617_v7 }
 0xeed   :  { %3447 = vmatprep.subr.bf16.mxu1 %v3722_v14 }
 0xfa7   :  { %v1392_v18 = vpop.f32.mrf.mxu1 }
 0xfa8   :  { %v1393_v19 = vadd.f32 %v3103_v17, %v1392_v18 }
 0xfa9   :  { %v3425_v20 = vpop.f32.mrf.mxu1 }
 0xfaa   :  { %v1399_v38 = vmul.f32 %v1393_v19, %v1393_v19  ;;  %v3124_v20 = vld [vmem:[%s4469_s5 + $0x1] ss:$0 sm:$0xff] }
 0xfab   :  { %v1395_v21 = vpop.f32.mrf.mxu1 }
 0xfac   :  { %v1401_v22 = vmul.f32 %v1399_v38, %v1393_v19  ;;  %v1396_v23 = vadd.f32 %v3103_v17, %v1395_v21 }
 0xfad   :  { %v3426_v24 = vpop.f32.mrf.mxu1 }
 0xfae   :  { %v1403_v25 = vmul.f32 0.044715, %v1401_v22  ;;  %v1400_v26 = vmul.f32 %v1396_v23, %v1396_v23 }
 0xfb0   :  { %v1405_v27 = vadd.f32 %v1403_v25, %v1393_v19  ;;  %v1402_v28 = vmul.f32 %v1400_v26, %v1396_v23 }
 0xfb2   :  { %v1407_v29 = vmul.f32 0.7978846, %v1405_v27  ;;  %v1404_v30 = vmul.f32 0.044715, %v1402_v28 }
 0xfb4   :  { %3666 = vtanh.f32 %v1407_v29  ;;  %v1406_v33 = vadd.f32 %v1404_v30, %v1396_v23 }
 0xfb6   :  { %v1408_v34 = vmul.f32 0.7978846, %v1406_v33 }
 0xfb8   :  { %3668 = vtanh.f32 %v1408_v34 }
 0xfc1   :  { %v3667_v35 = vpop.eup %3666 }
 0xfc2   :  { %v1411_v37 = vadd.f32 1.0, %v3667_v35 }
 0xfc4   :  { %v1413_v41 = vmul.f32 0.5, %v1411_v37 }
 0xfc5   :  { %v3669_v39 = vpop.eup %3668 }
 0xfc6   :  { %v1412_v43 = vadd.f32 1.0, %v3669_v39  ;;  %v1415_v45 = vmul.f32 %v1413_v41, %v1393_v19  ;;  %v4199_v39 = vld [vmem:[%s4470_s1] sm:$0xff] }
 0xfc8   :  { %v1414_v44 = vmul.f32 0.5, %v1412_v43 }
 0xfca   :  { %v1416_v46 = vmul.f32 %v1414_v44, %v1396_v23 }
 0xfcc   :  { %v1417_v47 = vpack.c.bf16 %v1416_v46, %v1415_v45 }
 0xfce   :  { %3436 = vmatmul.mubr.msk.bf16.vlgmr.msra.gmra.mxu0 %vm1457_vm4, %v1417_v47 }
 0xfcf   :  { %3455 = vmatprep.mubr.msk.bf16.mxu0 %vm3723_vm1, %v3722_v14 }
0x108e   :  { %v1495_v50 = vpop.f32.mrf.mxu0 }
0x108f   :  { %v1496_v48 = vadd.f32 %v3107_v49, %v1495_v50  ;;  %v4206_v50 = vld [vmem:[%s4470_s1 + $0x8] sm:$0xff] }
0x1090   :  { %v3437_v51 = vpop.f32.mrf.mxu0 }
0x1091   :  { %v1502_v52 = vadd.f32 %v1496_v48, %v1329_v11 }
0x1092   :  { %v1498_v53 = vpop.f32.mrf.mxu0 }
0x1093   :  { %v1499_v55 = vadd.f32 %v3107_v49, %v1498_v53  ;;  %v1506_v56 = vsel %vm64_vm0, %v1502_v52, 0.0 }
0x1094   :  { %1507 = vadd.xlane.f32.xlu0 %v1506_v56  ;;  %v3438_v58 = vpop.f32.mrf.mxu0 }
0x1095   :  { %v1503_v60 = vadd.f32 %v1499_v55, %v1330_v54  ;;  %v3113_v54 = vld [vmem:[%s4479_s14] ss:$0 sm:$0xff] }
0x1097   :  { %v1509_v61 = vsel %vm64_vm0, %v1503_v60, 0.0 }
0x1098   :  { %1510 = vadd.xlane.f32.xlu1 %v1509_v61 }
0x111d   :  { %v1508_v62 = vpop.xlane.xlu0 %1507 }
0x111e   :  { %v1512_v31 = vmul.f32 0.03125, %v1508_v62 }
0x1120   :  { %v1514_v63 = vsub.f32 %v1502_v52, %v1512_v31 }
0x1121   :  { %v1511_v32 = vpop.xlane.xlu1 %1510 }
0x1122   :  { %v1513_v0 = vmul.f32 0.03125, %v1511_v32  ;;  %v1516_v1 = vmul.f32 %v1514_v63, %v1514_v63 }
0x1124   :  { %v1515_v2 = vsub.f32 %v1503_v60, %v1513_v0  ;;  %v1518_v3 = vsel %vm64_vm0, %v1516_v1, 0.0 }
0x1125   :  { %1519 = vadd.xlane.f32.xlu0 %v1518_v3 }
0x1126   :  { %v1517_v4 = vmul.f32 %v1515_v2, %v1515_v2 }
0x1128   :  { %v1521_v5 = vsel %vm64_vm0, %v1517_v4, 0.0 }
0x1129   :  { %1522 = vadd.xlane.f32.xlu1 %v1521_v5 }
0x11ae   :  { %v1520_v8 = vpop.xlane.xlu0 %1519 }
0x11af   :  { %v1524_v9 = vmul.f32 0.03125, %v1520_v8 }
0x11b1   :  { %v1526_v36 = vadd.f32 1e-12, %v1524_v9 }
0x11b2   :  { %v1523_v57 = vpop.xlane.xlu1 %1522 }
0x11b3   :  { %3670 = vrsqrt.f32 %v1526_v36  ;;  %v1525_v40 = vmul.f32 0.03125, %v1523_v57 }
0x11b5   :  { %v1527_v59 = vadd.f32 1e-12, %v1525_v40 }
0x11b7   :  { %3672 = vrsqrt.f32 %v1527_v59 }
0x11c0   :  { %v3671_v10 = vpop.eup %3670 }
0x11c1   :  { %v1530_v11 = vmul.f32 %v3671_v10, %v1514_v63 }
0x11c3   :  { %v1538_v42 = vmul.f32 %v3113_v54, %v1530_v11 }
0x11c4   :  { %v3673_v12 = vpop.eup %3672 }
0x11c5   :  { %v1531_v13 = vmul.f32 %v3673_v12, %v1515_v2  ;;  %v4164_v17 = vadd.f32 %v3114_v15, %v1538_v42 }
0x11c7   :  { %v1539_v16 = vmul.f32 %v3113_v54, %v1531_v13 }
0x11c9   :  { %v4166_v18 = vadd.f32 %v3114_v15, %v1539_v16 }
0x11cb   :  { %v1558_v19 = vpack.c.bf16 %v4166_v18, %v4164_v17 }
0x11cd   :  { %3444 = vmatmul.mubr.msk.bf16.vlgmr.msra.gmra.mxu1 %vm64_vm0, %v1558_v19 }
0x11ce   :  { %3449 = vmatprep.mubr.msk.bf16.mxu1 %vm3723_vm1, %v3722_v14 }
0x128d   :  { %v1616_v38 = vpop.f32.mrf.mxu1 }
0x128e   :  { %v1617_v21 = vadd.f32 %v3124_v20, %v1616_v38 }
0x128f   :  { %v3445_v22 = vpop.f32.mrf.mxu1 }
0x1290   :  { %v4176_v23 = vpack.c.bf16 %v1617_v21, %v1617_v21 }
0x1291   :  { %v1619_v24 = vpop.f32.mrf.mxu1 }
0x1292   :  { %v1620_v25 = vadd.f32 %v3124_v20, %v1619_v24  ;;  %1626 = vrot.lane.b32.xlu0 %v4176_v23, %s3724_s3 }
0x1293   :  { %v3446_v26 = vpop.f32.mrf.mxu1 }
0x1294   :  { %v4180_v27 = vpack.c.bf16 %v1620_v25, %v1620_v25 }
0x1296   :  { %1675 = vrot.lane.b32.xlu1 %v4180_v27, %s3724_s3 }
0x1304   :  { %v1627_v28 = vpop.permute.xlu0 %1626 }
0x1305   :  { %v1632_v29 = vsel %vm187_vm2, %v1627_v28, 0 }
0x1306   :  { %3448 = vmatpush3.bf16.xpose.msra.mxu1 %v1632_v29 }
0x1307   :  { %3459 = vmatprep.subr.bf16.mxu1 %v3722_v14 }
0x1308   :  { %v1676_v30 = vpop.permute.xlu1 %1675 }
0x1309   :  { %v1681_v33 = vsel %vm187_vm2, %v1676_v30, 0 }
0x130a   :  { %3454 = vmatpush3.bf16.xpose.msra.mxu0 %v1681_v33 }
0x130b   :  { %3465 = vmatprep.subr.bf16.mxu0 %v3722_v14 }
0x130d   :  { %3450 = vmatmul.mubr.msk.bf16.vlgmr.msra.gmra.mxu1 %vm187_vm2, %v4176_v23 }
0x130e   :  { %3461 = vmatprep.mubr.msk.bf16.mxu1 %vm3723_vm1, %v3722_v14 }
0x1311   :  { %3456 = vmatmul.mubr.msk.bf16.vlgmr.msra.gmra.mxu0 %vm187_vm2, %v4180_v27 }
0x1312   :  { %3467 = vmatprep.mubr.msk.bf16.mxu0 %vm3723_vm1, %v3722_v14 }
0x13cd   :  { %v1668_v34 = vpop.f32.mrf.mxu1 }
0x13ce   :  { %v1723_v35 = vmul.f32 0.35355338, %v1668_v34 }
0x13cf   :  { %v3451_v37 = vpop.f32.mrf.mxu1 }
0x13d0   :  { %v1725_v41 = vadd.f32 %v4199_v39, %v1723_v35 }
0x13d1   :  { %v1671_v43 = vpop.f32.mrf.mxu1  ;;  %v1717_v44 = vpop.f32.mrf.mxu0 }
0x13d2   :  { %v1724_v45 = vmul.f32 0.35355338, %v1717_v44  ;;  %v1727_v46 = vsel %vm187_vm2, %v1725_v41, -inf }
0x13d3   :  { %1728 = vmax.xlane.f32.xlu1 %v1727_v46  ;;  %v3452_v47 = vpop.f32.mrf.mxu1  ;;  %v3457_v49 = vpop.f32.mrf.mxu0 }
0x13d4   :  { %v1726_v48 = vadd.f32 %v4206_v50, %v1724_v45 }
0x13d5   :  { %v1720_v51 = vpop.f32.mrf.mxu0 }
0x13d6   :  { %v1730_v52 = vsel %vm187_vm2, %v1726_v48, -inf }
0x13d7   :  { %1731 = vmax.xlane.f32.xlu0 %v1730_v52  ;;  %v3458_v53 = vpop.f32.mrf.mxu0 }
0x13e4   :  { %1799 = vrot.lane.b32.xlu1 %v4180_v27, %s3725_s4 }
0x13e8   :  { %1850 = vrot.lane.b32.xlu1 %v4176_v23, %s3726_s21 }
0x145c   :  { %v1729_v55 = vpop.xlane.xlu1 %1728 }
0x145d   :  { %v1733_v56 = vsub.f32 %v1725_v41, %v1729_v55 }
0x145f   :  { %v1735_v58 = vmul.f32 1.442695, %v1733_v56 }
0x1460   :  { %v1800_v60 = vpop.permute.xlu1 %1799  ;;  %v1732_v61 = vpop.xlane.xlu0 %1731 }
0x1461   :  { %3674 = vpow2.f32 %v1735_v58  ;;  %v1805_v62 = vsel %vm316_vm3, %v1800_v60, 0  ;;  %v1734_v31 = vsub.f32 %v1726_v48, %v1732_v61 }
0x1462   :  { %3466 = vmatpush3.bf16.msra.mxu0 %v1805_v62 }
0x1463   :  { %v1737_v63 = vmul.f32 1.442695, %v1734_v31  ;;  %3477 = vmatprep.subr.bf16.mxu0 %v3722_v14 }
0x1464   :  { %v1851_v3 = vpop.permute.xlu1 %1850 }
0x1465   :  { %3676 = vpow2.f32 %v1737_v63  ;;  %v1856_v40 = vsel %vm187_vm2, %v1851_v3, 0 }
0x146e   :  { %v3675_v32 = vpop.eup %3674 }
0x146f   :  { %v1739_v0 = vsel %vm187_vm2, %v3675_v32, 0.0 }
0x1470   :  { %1740 = vadd.xlane.f32.xlu0 %v1739_v0 }
0x1472   :  { %v3677_v1 = vpop.eup %3676 }
0x1473   :  { %v1742_v2 = vsel %vm187_vm2, %v3677_v1, 0.0 }
0x1474   :  { %1743 = vadd.xlane.f32.xlu1 %v1742_v2 }
0x1485   :  { %1900 = vrot.lane.b32.xlu1 %v4180_v27, %s3726_s21 }
0x1486   :  { %1751 = vrot.lane.b32.xlu0 %v4176_v23, %s3725_s4 }
0x1489   :  { %1898 = vrot.lane.b32.xlu1 %v4180_v27, %s3727_s22 }
0x148a   :  { %1848 = vrot.lane.b32.xlu0 %v4176_v23, %s3727_s22 }
0x14f9   :  { %v1741_v4 = vpop.xlane.xlu0 %1740 }
0x14fa   :  { %3678 = vrcp.f32 %v1741_v4 }
0x14fd   :  { %v1744_v5 = vpop.xlane.xlu1 %1743  ;;  %v1752_v6 = vpop.permute.xlu0 %1751 }
0x14fe   :  { %3680 = vrcp.f32 %v1744_v5  ;;  %v1757_v7 = vsel %vm316_vm3, %v1752_v6, 0  ;;  %v3119_v5 = vld [vmem:[%s4471_s6 + $0x10] sm:$0xf] }
0x14ff   :  { %3460 = vmatpush3.bf16.msra.mxu1 %v1757_v7 }
0x1500   :  { %3471 = vmatprep.subr.bf16.mxu1 %v3722_v14 }
0x1501   :  { %v1901_v10 = vpop.permute.xlu1 %1900  ;;  %v1849_v12 = vpop.permute.xlu0 %1848 }
0x1502   :  { %v1906_v54 = vsel %vm187_vm2, %v1901_v10, 0 }
0x1505   :  { %v1899_v13 = vpop.permute.xlu1 %1898 }
0x1507   :  { %v3679_v8 = vpop.eup %3678 }
0x1508   :  { %v1747_v9 = vmul.f32 %v3679_v8, %v3675_v32  ;;  %v2124_v8 = vsel %vm316_vm3, %v3119_v5, 0 }
0x150a   :  { %v1749_v36 = vpack.c.bf16 %v1747_v9, %v1747_v9 }
0x150b   :  { %v3681_v57 = vpop.eup %3680 }
0x150c   :  { %3462 = vmatmul.mubr.msk.bf16.vlgmr.msra.gmra.mxu1 %vm187_vm2, %v1749_v36  ;;  %v1748_v59 = vmul.f32 %v3681_v57, %v3677_v1 }
0x150d   :  { %3472 = vmatpush3.bf16.xpose.msra.mxu1 %v1856_v40  ;;  %3473 = vmatprep.mubr.msk.bf16.mxu1 %vm3723_vm1, %v3722_v14 }
0x150e   :  { %v1750_v11 = vpack.c.bf16 %v1748_v59, %v1748_v59  ;;  %3483 = vmatprep.subr.bf16.mxu1 %v3722_v14  ;;  %v3120_v59 = vld [vmem:[%s4471_s6 + $0x14] sm:$0xf] }
0x150f   :  { %v2077_v10 = vsel %vm316_vm3, %v3120_v59, 0 }
0x1510   :  { %3468 = vmatmul.mubr.msk.bf16.vlgmr.msra.gmra.mxu0 %vm187_vm2, %v1750_v11 }
0x1511   :  { %3478 = vmatpush3.bf16.xpose.msra.mxu0 %v1906_v54  ;;  %3479 = vmatprep.mubr.msk.bf16.mxu0 %vm3723_vm1, %v3722_v14 }
0x1512   :  { %3489 = vmatprep.subr.bf16.mxu0 %v3722_v14 }
0x1514   :  { %3474 = vmatmul.mubr.msk.bf16.vlgmr.msra.gmra.mxu1 %vm187_vm2, %v1849_v12 }
0x1515   :  { %3485 = vmatprep.mubr.msk.bf16.mxu1 %vm3723_vm1, %v3722_v14 }
0x1518   :  { %3480 = vmatmul.mubr.msk.bf16.vlgmr.msra.gmra.mxu0 %vm187_vm2, %v1899_v13 }
0x1519   :  { %3491 = vmatprep.mubr.msk.bf16.mxu0 %vm3723_vm1, %v3722_v14 }
0x15cc   :  { %v4244_v42 = vpop.f32.mrf.mxu1 }
0x15ce   :  { %v3463_v15 = vpop.f32.mrf.mxu1 }
0x15d0   :  { %v1796_v16 = vpop.f32.mrf.mxu1  ;;  %v4246_v19 = vpop.f32.mrf.mxu0 }
0x15d1   :  { %v1847_v20 = vpack.c.bf16 %v4246_v19, %v4244_v42 }
0x15d2   :  { %v3464_v38 = vpop.f32.mrf.mxu1  ;;  %v3469_v21 = vpop.f32.mrf.mxu0 }
0x15d4   :  { %v1844_v22 = vpop.f32.mrf.mxu0  ;;  %v1892_v24 = vpop.f32.mrf.mxu1 }
0x15d5   :  { %v1948_v25 = vmul.f32 0.35355338, %v1892_v24 }
0x15d6   :  { %v3470_v26 = vpop.f32.mrf.mxu0  ;;  %v3475_v28 = vpop.f32.mrf.mxu1 }
0x15d7   :  { %v1950_v29 = vadd.f32 %v4199_v39, %v1948_v25 }
0x15d8   :  { %v1895_v30 = vpop.f32.mrf.mxu1  ;;  %v1942_v33 = vpop.f32.mrf.mxu0 }
0x15d9   :  { %v1949_v34 = vmul.f32 0.35355338, %v1942_v33  ;;  %v1952_v35 = vsel %vm187_vm2, %v1950_v29, -inf }
0x15da   :  { %1953 = vmax.xlane.f32.xlu0 %v1952_v35  ;;  %v3476_v37 = vpop.f32.mrf.mxu1  ;;  %v3481_v41 = vpop.f32.mrf.mxu0 }
0x15db   :  { %v1951_v43 = vadd.f32 %v4206_v50, %v1949_v34 }
0x15dc   :  { %v1945_v44 = vpop.f32.mrf.mxu0 }
0x15dd   :  { %v1955_v45 = vsel %vm187_vm2, %v1951_v43, -inf }
0x15de   :  { %1956 = vmax.xlane.f32.xlu1 %v1955_v45  ;;  %v3482_v46 = vpop.f32.mrf.mxu0 }
0x15ef   :  { %2024 = vrot.lane.b32.xlu1 %v4180_v27, %s3728_s2 }
0x15f3   :  { %2169 = vrot.lane.b32.xlu1 %v4176_v23, %s3729_s23 }
0x15f7   :  { %2219 = vrot.lane.b32.xlu1 %v4180_v27, %s3729_s23  ;;  %s4499_s23 = smov 104  }
0x15fb   :  { %2217 = vrot.lane.b32.xlu1 %v4180_v27, %s3730_s24 }
0x1663   :  { %v1954_v47 = vpop.xlane.xlu0 %1953 }
0x1664   :  { %v1958_v49 = vsub.f32 %v1950_v29, %v1954_v47 }
0x1666   :  { %v1960_v48 = vmul.f32 1.442695, %v1958_v49 }
0x1667   :  { %v1957_v51 = vpop.xlane.xlu1 %1956 }
0x1668   :  { %3682 = vpow2.f32 %v1960_v48  ;;  %v1959_v52 = vsub.f32 %v1951_v43, %v1957_v51 }
0x166a   :  { %v1962_v53 = vmul.f32 1.442695, %v1959_v52 }
0x166b   :  { %v2025_v55 = vpop.permute.xlu1 %2024 }
0x166c   :  { %3684 = vpow2.f32 %v1962_v53  ;;  %v2030_v56 = vsel %vm316_vm3, %v2025_v55, 0 }
0x166d   :  { %3490 = vmatpush3.bf16.msra.mxu0 %v2030_v56 }
0x166e   :  { %3501 = vmatprep.subr.bf16.mxu0 %v3722_v14 }
0x166f   :  { %v2170_v9 = vpop.permute.xlu1 %2169 }
0x1670   :  { %v2175_v19 = vsel %vm187_vm2, %v2170_v9, 0 }
0x1673   :  { %v2220_v36 = vpop.permute.xlu1 %2219 }
0x1674   :  { %v2225_v57 = vsel %vm187_vm2, %v2220_v36, 0 }
0x1675   :  { %v3683_v58 = vpop.eup %3682 }
0x1676   :  { %v1964_v60 = vsel %vm187_vm2, %v3683_v58, 0.0 }
0x1677   :  { %1965 = vadd.xlane.f32.xlu0 %v1964_v60  ;;  %v2218_v40 = vpop.permute.xlu1 %2217 }
0x1679   :  { %v3685_v61 = vpop.eup %3684 }
0x167a   :  { %v1967_v62 = vsel %vm187_vm2, %v3685_v61, 0.0 }
0x167b   :  { %1968 = vadd.xlane.f32.xlu0 %v1967_v62 }
0x1691   :  { %1976 = vrot.lane.b32.xlu0 %v4176_v23, %s3728_s2  ;;  %s4498_s2 = smov 72  }
0x1695   :  { %2167 = vrot.lane.b32.xlu0 %v4176_v23, %s3730_s24 }
0x1700   :  { %v1966_v31 = vpop.xlane.xlu0 %1965 }
0x1701   :  { %3686 = vrcp.f32 %v1966_v31 }
0x1704   :  { %v1969_v63 = vpop.xlane.xlu0 %1968 }
0x1705   :  { %3688 = vrcp.f32 %v1969_v63 }
0x1708   :  { %v1977_v32 = vpop.permute.xlu0 %1976 }
0x1709   :  { %v1982_v0 = vsel %vm316_vm3, %v1977_v32, 0 }
0x170a   :  { %3484 = vmatpush3.bf16.msra.mxu1 %v1982_v0 }
0x170b   :  { %3495 = vmatprep.subr.bf16.mxu1 %v3722_v14 }
0x170c   :  { %v2168_v22 = vpop.permute.xlu0 %2167 }
0x170e   :  { %v3687_v1 = vpop.eup %3686 }
0x170f   :  { %v1972_v2 = vmul.f32 %v3687_v1, %v3683_v58 }
0x1711   :  { %v1974_v3 = vpack.c.bf16 %v1972_v2, %v1972_v2 }
0x1712   :  { %v3689_v4 = vpop.eup %3688 }
0x1713   :  { %3486 = vmatmul.mubr.msk.bf16.vlgmr.msra.gmra.mxu1 %vm187_vm2, %v1974_v3  ;;  %v1973_v6 = vmul.f32 %v3689_v4, %v3685_v61 }
0x1714   :  { %3497 = vmatprep.mubr.msk.bf16.mxu1 %vm3723_vm1, %v3722_v14  ;;  %3496 = vmatpush3.bf16.msra.mxu1 %v2077_v10 }
0x1715   :  { %v1975_v7 = vpack.c.bf16 %v1973_v6, %v1973_v6  ;;  %3507 = vmatprep.subr.bf16.mxu1 %v3722_v14 }
0x1717   :  { %3492 = vmatmul.mubr.msk.bf16.vlgmr.msra.gmra.mxu0 %vm187_vm2, %v1975_v7 }
0x1718   :  { %3502 = vmatpush3.bf16.msra.mxu0 %v2124_v8  ;;  %3503 = vmatprep.mubr.msk.bf16.mxu0 %vm3723_vm1, %v3722_v14 }
0x1719   :  { %3513 = vmatprep.subr.bf16.mxu0 %v3722_v14 }
0x171f   :  { %3504 = vmatmul.mubr.msk.bf16.vlgmr.msra.gmra.mxu0 %vm187_vm2, %v1847_v20 }
0x1720   :  { %3514 = vmatpush3.bf16.xpose.msra.mxu0 %v2225_v57  ;;  %3515 = vmatprep.mubr.msk.bf16.mxu0 %vm3723_vm1, %v3722_v14 }
0x1721   :  { %3525 = vmatprep.subr.bf16.mxu0 %v3722_v14 }
0x1727   :  { %3516 = vmatmul.mubr.msk.bf16.vlgmr.msra.gmra.mxu0 %vm187_vm2, %v2218_v40 }
0x1728   :  { %3527 = vmatprep.mubr.msk.bf16.mxu0 %vm3723_vm1, %v3722_v14 }
0x17d3   :  { %v2018_v11 = vpop.f32.mrf.mxu1 }
0x17d5   :  { %v3487_v54 = vpop.f32.mrf.mxu1 }
0x17d7   :  { %v2021_v12 = vpop.f32.mrf.mxu1  ;;  %v2066_v13 = vpop.f32.mrf.mxu0 }
0x17d8   :  { %v2072_v42 = vpack.c.bf16 %v2066_v13, %v2018_v11 }
0x17d9   :  { %v3488_v15 = vpop.f32.mrf.mxu1  ;;  %v3493_v16 = vpop.f32.mrf.mxu0 }
0x17da   :  { %3498 = vmatmul.mubr.msk.bf16.vlgmr.msra.gmra.mxu1 %vm187_vm2, %v2072_v42  ;;  %v3121_v15 = vld [vmem:[%s4471_s6 + $0x18] sm:$0xf] }
0x17db   :  { %3508 = vmatpush3.bf16.xpose.msra.mxu1 %v2175_v19  ;;  %v2069_v20 = vpop.f32.mrf.mxu0  ;;  %3509 = vmatprep.mubr.msk.bf16.mxu1 %vm3723_vm1, %v3722_v14  ;;  %v2396_v16 = vsel %vm316_vm3, %v3121_v15, 0 }
0x17dc   :  { %3519 = vmatprep.subr.bf16.mxu1 %v3722_v14 }
0x17dd   :  { %v3494_v38 = vpop.f32.mrf.mxu0 }
0x17df   :  { %v4304_v21 = vpop.f32.mrf.mxu0 }
0x17e1   :  { %v3505_v24 = vpop.f32.mrf.mxu0 }
0x17e2   :  { %3510 = vmatmul.mubr.msk.bf16.vlgmr.msra.gmra.mxu1 %vm187_vm2, %v2168_v22 }
0x17e3   :  { %v4307_v25 = vpop.f32.mrf.mxu0  ;;  %3521 = vmatprep.mubr.msk.bf16.mxu1 %vm3723_vm1, %v3722_v14 }
0x17e5   :  { %v3506_v26 = vpop.f32.mrf.mxu0 }
0x17e7   :  { %v2261_v28 = vpop.f32.mrf.mxu0 }
0x17e8   :  { %v2268_v29 = vmul.f32 0.35355338, %v2261_v28 }
0x17e9   :  { %v3517_v30 = vpop.f32.mrf.mxu0 }
0x17ea   :  { %v2270_v33 = vadd.f32 %v4206_v50, %v2268_v29 }
0x17eb   :  { %v2264_v34 = vpop.f32.mrf.mxu0 }
0x17ec   :  { %v2274_v35 = vsel %vm187_vm2, %v2270_v33, -inf }
0x17ed   :  { %2275 = vmax.xlane.f32.xlu1 %v2274_v35  ;;  %v3518_v37 = vpop.f32.mrf.mxu0 }
0x17fe   :  { %2343 = vrot.lane.b32.xlu1 %v4180_v27, %s3731_s29 }
0x1802   :  { %2443 = vrot.lane.b32.xlu1 %v4176_v23, %s4498_s2 }
0x1806   :  { %2493 = vrot.lane.b32.xlu1 %v4180_v27, %s4498_s2 }
0x180a   :  { %2491 = vrot.lane.b32.xlu1 %v4180_v27, %s4499_s23 }
0x1876   :  { %v2276_v41 = vpop.xlane.xlu1 %2275 }
0x1877   :  { %v2278_v45 = vsub.f32 %v2270_v33, %v2276_v41 }
0x1879   :  { %v2281_v46 = vmul.f32 1.442695, %v2278_v45 }
0x187a   :  { %v2344_v43 = vpop.permute.xlu1 %2343 }
0x187b   :  { %v2349_v44 = vsel %vm316_vm3, %v2344_v43, 0  ;;  %3690 = vpow2.f32 %v2281_v46 }
0x187c   :  { %3526 = vmatpush3.bf16.msra.mxu0 %v2349_v44 }
0x187d   :  { %3537 = vmatprep.subr.bf16.mxu0 %v3722_v14 }
0x187e   :  { %v2444_v6 = vpop.permute.xlu1 %2443 }
0x187f   :  { %v2449_v8 = vsel %vm187_vm2, %v2444_v6, 0 }
0x1882   :  { %v2494_v29 = vpop.permute.xlu1 %2493 }
0x1883   :  { %v2499_v35 = vsel %vm187_vm2, %v2494_v29, 0 }
0x1886   :  { %v2492_v41 = vpop.permute.xlu1 %2491 }
0x1888   :  { %v3691_v61 = vpop.eup %3690 }
0x1889   :  { %v2286_v31 = vsel %vm187_vm2, %v3691_v61, 0.0 }
0x189a   :  { %v4323_v47 = vpop.f32.mrf.mxu1 }
0x189c   :  { %v3499_v49 = vpop.f32.mrf.mxu1 }
0x189e   :  { %v4325_v48 = vpop.f32.mrf.mxu1 }
0x18a0   :  { %v3500_v51 = vpop.f32.mrf.mxu1 }
0x18a1   :  { %v2161_v51 = vadd.f32 %v4304_v21, %v4323_v47 }
0x18a2   :  { %v2211_v52 = vpop.f32.mrf.mxu1 }
0x18a3   :  { %v2267_v53 = vmul.f32 0.35355338, %v2211_v52 }
0x18a4   :  { %v3511_v55 = vpop.f32.mrf.mxu1 }
0x18a5   :  { %v2269_v56 = vadd.f32 %v4199_v39, %v2267_v53 }
0x18a6   :  { %v2214_v58 = vpop.f32.mrf.mxu1 }
0x18a7   :  { %v2271_v60 = vsel %vm187_vm2, %v2269_v56, -inf }
0x18a8   :  { %2272 = vmax.xlane.f32.xlu0 %v2271_v60  ;;  %v3512_v62 = vpop.f32.mrf.mxu1 }
0x18ac   :  { %2287 = vadd.xlane.f32.xlu0 %v2286_v31 }
0x1931   :  { %v2273_v63 = vpop.xlane.xlu0 %2272 }
0x1932   :  { %v2277_v32 = vsub.f32 %v2269_v56, %v2273_v63  ;;  %v2164_v56 = vadd.f32 %v4307_v25, %v4325_v48 }
0x1934   :  { %v2279_v0 = vmul.f32 1.442695, %v2277_v32 }
0x1935   :  { %v2288_v1 = vpop.xlane.xlu0 %2287 }
0x1936   :  { %3692 = vpow2.f32 %v2279_v0 }
0x1937   :  { %3694 = vrcp.f32 %v2288_v1 }
0x1943   :  { %v3693_v2 = vpop.eup %3692 }
0x1944   :  { %v3695_v3 = vpop.eup %3694  ;;  %v2283_v4 = vsel %vm187_vm2, %v3693_v2, 0.0 }
0x1945   :  { %2284 = vadd.xlane.f32.xlu0 %v2283_v4  ;;  %v2292_v5 = vmul.f32 %v3695_v3, %v3691_v61 }
0x1947   :  { %v2294_v7 = vpack.c.bf16 %v2292_v5, %v2292_v5 }
0x1949   :  { %3528 = vmatmul.mubr.msk.bf16.vlgmr.msra.gmra.mxu0 %vm187_vm2, %v2294_v7 }
0x194a   :  { %3538 = vmatpush3.bf16.xpose.msra.mxu0 %v2449_v8  ;;  %3539 = vmatprep.mubr.msk.bf16.mxu0 %vm3723_vm1, %v3722_v14 }
0x194b   :  { %3549 = vmatprep.subr.bf16.mxu0 %v3722_v14 }
0x195b   :  { %2295 = vrot.lane.b32.xlu0 %v4176_v23, %s3731_s29 }
0x195f   :  { %2441 = vrot.lane.b32.xlu0 %v4176_v23, %s4499_s23 }
0x19ce   :  { %v2285_v9 = vpop.xlane.xlu0 %2284 }
0x19cf   :  { %3696 = vrcp.f32 %v2285_v9 }
0x19d2   :  { %v2296_v36 = vpop.permute.xlu0 %2295 }
0x19d3   :  { %v2301_v57 = vsel %vm316_vm3, %v2296_v36, 0 }
0x19d4   :  { %3520 = vmatpush3.bf16.msra.mxu1 %v2301_v57 }
0x19d5   :  { %3531 = vmatprep.subr.bf16.mxu1 %v3722_v14 }
0x19d6   :  { %v2442_v40 = vpop.permute.xlu0 %2441 }
0x19d7   :  { %3540 = vmatmul.mubr.msk.bf16.vlgmr.msra.gmra.mxu0 %vm187_vm2, %v2442_v40 }
0x19d8   :  { %3551 = vmatprep.mubr.msk.bf16.mxu0 %vm3723_vm1, %v3722_v14 }
0x19dc   :  { %v3697_v59 = vpop.eup %3696 }
0x19dd   :  { %v2291_v10 = vmul.f32 %v3697_v59, %v3693_v2  ;;  %v3122_v59 = vld [vmem:[%s4471_s6 + $0x1c] sm:$0xf] }
0x19df   :  { %v2293_v11 = vpack.c.bf16 %v2291_v10, %v2291_v10  ;;  %v2670_v10 = vsel %vm316_vm3, %v3122_v59, 0 }
0x19e1   :  { %3522 = vmatmul.mubr.msk.bf16.vlgmr.msra.gmra.mxu1 %vm187_vm2, %v2293_v11 }
0x19e2   :  { %3533 = vmatprep.mubr.msk.bf16.mxu1 %vm3723_vm1, %v3722_v14  ;;  %3532 = vmatpush3.bf16.msra.mxu1 %v2396_v16 }
0x19e3   :  { %3543 = vmatprep.subr.bf16.mxu1 %v3722_v14 }
0x1a09   :  { %v2385_v54 = vpop.f32.mrf.mxu0 }
0x1a0b   :  { %v3529_v12 = vpop.f32.mrf.mxu0 }
0x1a0d   :  { %v2388_v13 = vpop.f32.mrf.mxu0 }
0x1a0f   :  { %v3530_v42 = vpop.f32.mrf.mxu0 }
0x1a97   :  { %v2485_v19 = vpop.f32.mrf.mxu0 }
0x1a98   :  { %v2541_v20 = vmul.f32 0.35355338, %v2485_v19 }
0x1a99   :  { %v3541_v38 = vpop.f32.mrf.mxu0 }
0x1a9a   :  { %v2543_v22 = vadd.f32 %v4199_v39, %v2541_v20 }
0x1a9b   :  { %v2488_v24 = vpop.f32.mrf.mxu0 }
0x1a9c   :  { %v2545_v26 = vsel %vm187_vm2, %v2543_v22, -inf }
0x1a9d   :  { %2546 = vmax.xlane.f32.xlu0 %v2545_v26  ;;  %v3542_v28 = vpop.f32.mrf.mxu0 }
0x1aa1   :  { %v2337_v30 = vpop.f32.mrf.mxu1 }
0x1aa2   :  { %v2391_v33 = vpack.c.bf16 %v2385_v54, %v2337_v30 }
0x1aa3   :  { %v3523_v34 = vpop.f32.mrf.mxu1 }
0x1aa4   :  { %3534 = vmatmul.mubr.msk.bf16.vlgmr.msra.gmra.mxu1 %vm187_vm2, %v2391_v33 }
0x1aa5   :  { %3544 = vmatpush3.bf16.xpose.msra.mxu1 %v2499_v35  ;;  %v2340_v37 = vpop.f32.mrf.mxu1  ;;  %3545 = vmatprep.mubr.msk.bf16.mxu1 %vm3723_vm1, %v3722_v14 }
0x1aa6   :  { %3555 = vmatprep.subr.bf16.mxu1 %v3722_v14 }
0x1aa7   :  { %v3524_v39 = vpop.f32.mrf.mxu1 }
0x1aac   :  { %3546 = vmatmul.mubr.msk.bf16.vlgmr.msra.gmra.mxu1 %vm187_vm2, %v2492_v41 }
0x1aad   :  { %3557 = vmatprep.mubr.msk.bf16.mxu1 %vm3723_vm1, %v3722_v14 }
0x1b26   :  { %v2547_v43 = vpop.xlane.xlu0 %2546 }
0x1b27   :  { %v2551_v44 = vsub.f32 %v2543_v22, %v2547_v43  ;;  %v3149_v22 = vld [vmem:[%s4472_s7 + $0x1] ss:$0 sm:$0xff] }
0x1b29   :  { %v2553_v45 = vmul.f32 1.442695, %v2551_v44 }
0x1b2b   :  { %3698 = vpow2.f32 %v2553_v45 }
0x1b38   :  { %v3699_v46 = vpop.eup %3698 }
0x1b39   :  { %v2557_v49 = vsel %vm187_vm2, %v3699_v46, 0.0 }
0x1b3a   :  { %2558 = vadd.xlane.f32.xlu0 %v2557_v49 }
0x1b64   :  { %v2432_v52 = vpop.f32.mrf.mxu1 }
0x1b65   :  { %v2439_v53 = vadd.f32 %v2432_v52, %v2161_v51 }
0x1b66   :  { %v3535_v55 = vpop.f32.mrf.mxu1 }
0x1b68   :  { %v2435_v58 = vpop.f32.mrf.mxu1 }
0x1b69   :  { %v2440_v60 = vadd.f32 %v2435_v58, %v2164_v56  ;;  %v3619_v56 = vld [vmem:[%s4473_s10 + $0x10] sm:$0xff]  }
0x1b6a   :  { %v3536_v61 = vpop.f32.mrf.mxu1 }
0x1b6c   :  { %v2535_v62 = vpop.f32.mrf.mxu1 }
0x1b6d   :  { %v2542_v31 = vmul.f32 0.35355338, %v2535_v62 }
0x1b6e   :  { %v3547_v63 = vpop.f32.mrf.mxu1 }
0x1b6f   :  { %v2544_v32 = vadd.f32 %v4206_v50, %v2542_v31 }
0x1b70   :  { %v2538_v0 = vpop.f32.mrf.mxu1 }
0x1b71   :  { %v2548_v1 = vsel %vm187_vm2, %v2544_v32, -inf }
0x1b72   :  { %2549 = vmax.xlane.f32.xlu1 %v2548_v1  ;;  %v3548_v2 = vpop.f32.mrf.mxu1  ;;  %v3152_v1 = vld [vmem:[%s4474_s8 + $0x1] ss:$0 sm:$0xff] }
0x1b83   :  { %2617 = vrot.lane.b32.xlu1 %v4180_v27, %s4500_s27 }
0x1bc3   :  { %v2559_v5 = vpop.xlane.xlu0 %2558 }
0x1bfb   :  { %v2550_v21 = vpop.xlane.xlu1 %2549 }
0x1bfc   :  { %v2552_v47 = vsub.f32 %v2544_v32, %v2550_v21 }
0x1bfe   :  { %v2555_v3 = vmul.f32 1.442695, %v2552_v47 }
0x1bff   :  { %v2618_v25 = vpop.permute.xlu1 %2617 }
0x1c00   :  { %3700 = vpow2.f32 %v2555_v3  ;;  %v2623_v48 = vsel %vm316_vm3, %v2618_v25, 0  ;;  %v3153_v3 = vld [vmem:[%s4475_s9 + $0x1] ss:$0 sm:$0xff] }
0x1c01   :  { %3556 = vmatpush3.bf16.msra.mxu1 %v2623_v48  ;;  %3702 = vrcp.f32 %v2559_v5  ;;  %v3620_v5 = vld [vmem:[%s4476_s12 + $0x38] sm:$0xff]  }
0x1c02   :  { %3567 = vmatprep.subr.bf16.mxu1 %v3722_v14 }
0x1c0d   :  { %v3701_v4 = vpop.eup %3700 }
0x1c0e   :  { %v2560_v50 = vsel %vm187_vm2, %v3701_v4, 0.0  ;;  %v3703_v27 = vpop.eup %3702 }
0x1c0f   :  { %2561 = vadd.xlane.f32.xlu0 %v2560_v50  ;;  %v2565_v7 = vmul.f32 %v3703_v27, %v3699_v46  ;;  %v3621_v27 = vld [vmem:[%s4476_s12 + $0x30] sm:$0xff]  }
0x1c11   :  { %v2567_v36 = vpack.c.bf16 %v2565_v7, %v2565_v7  ;;  %v3623_v7 = vld [vmem:[%s4476_s12 + $0x20] sm:$0xff]  }
0x1c25   :  { %2569 = vrot.lane.b32.xlu0 %v4176_v23, %s4500_s27 }
0x1c98   :  { %v2562_v6 = vpop.xlane.xlu0 %2561 }
0x1c99   :  { %3704 = vrcp.f32 %v2562_v6  ;;  %v3622_v6 = vld [vmem:[%s4476_s12 + $0x28] sm:$0xff]  }
0x1c9c   :  { %v2570_v8 = vpop.permute.xlu0 %2569 }
0x1c9d   :  { %v2575_v9 = vsel %vm316_vm3, %v2570_v8, 0  ;;  %v3159_v8 = vld [vmem:[%s4477_s11 + $0x1] ss:$0 sm:$0xff] }
0x1c9e   :  { %3550 = vmatpush3.bf16.msra.mxu0 %v2575_v9 }
0x1c9f   :  { %3561 = vmatprep.subr.bf16.mxu0 %v3722_v14 }
0x1ca1   :  { %3552 = vmatmul.mubr.msk.bf16.vlgmr.msra.gmra.mxu0 %vm187_vm2, %v2567_v36 }
0x1ca2   :  { %3563 = vmatprep.mubr.msk.bf16.mxu0 %vm3723_vm1, %v3722_v14  ;;  %3562 = vmatpush3.bf16.msra.mxu0 %v2670_v10 }
0x1ca3   :  { %3575 = vmatprep.subr.bf16.mxu0 %v3722_v14 }
0x1ca6   :  { %v3705_v57 = vpop.eup %3704 }
0x1ca7   :  { %v2566_v23 = vmul.f32 %v3705_v57, %v3701_v4 }
0x1ca9   :  { %v2568_v40 = vpack.c.bf16 %v2566_v23, %v2566_v23 }
0x1cab   :  { %3558 = vmatmul.mubr.msk.bf16.vlgmr.msra.gmra.mxu1 %vm187_vm2, %v2568_v40 }
0x1cac   :  { %3571 = vmatprep.mubr.msk.bf16.mxu1 %vm3723_vm1, %v3722_v14 }
0x1d61   :  { %v2611_v11 = vpop.f32.mrf.mxu0 }
0x1d63   :  { %v3553_v54 = vpop.f32.mrf.mxu0 }
0x1d65   :  { %v2614_v12 = vpop.f32.mrf.mxu0 }
0x1d67   :  { %v3554_v13 = vpop.f32.mrf.mxu0 }
0x1d6b   :  { %v2659_v42 = vpop.f32.mrf.mxu1 }
0x1d6c   :  { %v2665_v15 = vpack.c.bf16 %v2659_v42, %v2611_v11 }
0x1d6d   :  { %v3559_v16 = vpop.f32.mrf.mxu1 }
0x1d6e   :  { %3564 = vmatmul.mubr.msk.bf16.vlgmr.msra.gmra.mxu0 %vm187_vm2, %v2665_v15 }
0x1d6f   :  { %v2662_v19 = vpop.f32.mrf.mxu1  ;;  %3583 = vmatprep.mubr.msk.bf16.mxu0 %vm3723_vm1, %v3722_v14  ;;  %3576 = vmatpush3.bf16.msra.mxu0 %v3620_v5 }
0x1d70   :  { %3577 = vmatprep.subr.bf16.mxu0 %v3722_v14 }
0x1d71   :  { %v3560_v20 = vpop.f32.mrf.mxu1 }
0x1d73   :  { %3578 = vmatpush3.bf16.msra.mxu0 %v3621_v27 }
0x1d74   :  { %3579 = vmatprep.subr.bf16.mxu0 %v3722_v14 }
0x1d77   :  { %3580 = vmatpush3.bf16.msra.mxu0 %v3622_v6 }
0x1d78   :  { %3581 = vmatprep.subr.bf16.mxu0 %v3722_v14 }
0x1d7b   :  { %3582 = vmatpush3.bf16.msra.mxu0 %v3623_v7 }
0x1e2e   :  { %v2706_v38 = vpop.f32.mrf.mxu0 }
0x1e2f   :  { %v2713_v24 = vadd.f32 %v2706_v38, %v2439_v53 }
0x1e30   :  { %v3565_v26 = vpop.f32.mrf.mxu0 }
0x1e31   :  { %v2723_v28 = vadd.f32 %v3149_v22, %v2713_v24 }
0x1e32   :  { %v2709_v29 = vpop.f32.mrf.mxu0 }
0x1e33   :  { %v2714_v30 = vadd.f32 %v2709_v29, %v2440_v60  ;;  %v2725_v33 = vadd.f32 %v2723_v28, %v4164_v17 }
0x1e34   :  { %v3566_v34 = vpop.f32.mrf.mxu0 }
0x1e35   :  { %v2724_v35 = vadd.f32 %v3149_v22, %v2714_v30  ;;  %v2731_v37 = vsel %vm64_vm0, %v2725_v33, 0.0 }
0x1e36   :  { %2732 = vadd.xlane.f32.xlu1 %v2731_v37 }
0x1e37   :  { %v2726_v39 = vadd.f32 %v2724_v35, %v4166_v18  ;;  %v3618_v18 = vld [vmem:[%s4473_s10 + $0x18] sm:$0xff]   ;;  %v3172_v35 = vld [vmem:[%s4478_s13 + $0x1] ss:$0 sm:$0xff] }
0x1e38   :  { %3568 = vmatpush3.bf16.msra.mxu1 %v3618_v18 }
0x1e39   :  { %v2734_v41 = vsel %vm64_vm0, %v2726_v39, 0.0  ;;  %3569 = vmatprep.subr.bf16.mxu1 %v3722_v14 }
0x1e3a   :  { %2735 = vadd.xlane.f32.xlu0 %v2734_v41 }
0x1e3c   :  { %3570 = vmatpush3.bf16.msra.mxu1 %v3619_v56 }
0x1e3d   :  { %3587 = vmatprep.subr.bf16.mxu1 %v3722_v14 }
0x1ebf   :  { %v2733_v43 = vpop.xlane.xlu1 %2732 }
0x1ec0   :  { %v2737_v44 = vmul.f32 0.03125, %v2733_v43 }
0x1ec2   :  { %v2739_v45 = vsub.f32 %v2725_v33, %v2737_v44 }
0x1ec3   :  { %v2736_v46 = vpop.xlane.xlu0 %2735 }
0x1ec4   :  { %v2738_v49 = vmul.f32 0.03125, %v2736_v46  ;;  %v2741_v51 = vmul.f32 %v2739_v45, %v2739_v45 }
0x1ec6   :  { %v2740_v52 = vsub.f32 %v2726_v39, %v2738_v49  ;;  %v2743_v53 = vsel %vm64_vm0, %v2741_v51, 0.0 }
0x1ec7   :  { %2744 = vadd.xlane.f32.xlu0 %v2743_v53 }
0x1ec8   :  { %v2742_v17 = vmul.f32 %v2740_v52, %v2740_v52 }
0x1eca   :  { %v2746_v55 = vsel %vm64_vm0, %v2742_v17, 0.0 }
0x1ecb   :  { %2747 = vadd.xlane.f32.xlu1 %v2746_v55 }
0x1f50   :  { %v2745_v58 = vpop.xlane.xlu0 %2744 }
0x1f51   :  { %v2749_v60 = vmul.f32 0.03125, %v2745_v58 }
0x1f53   :  { %v2751_v61 = vadd.f32 1e-12, %v2749_v60 }
0x1f54   :  { %v2748_v62 = vpop.xlane.xlu1 %2747 }
0x1f55   :  { %3706 = vrsqrt.f32 %v2751_v61  ;;  %v2750_v31 = vmul.f32 0.03125, %v2748_v62 }
0x1f57   :  { %v2752_v63 = vadd.f32 1e-12, %v2750_v31 }
0x1f59   :  { %3708 = vrsqrt.f32 %v2752_v63  ;;  %v3624_v63 = vld [vmem:[%s4481_s16 + $0x8] sm:$0xff]  }
0x1f62   :  { %v3707_v32 = vpop.eup %3706 }
0x1f63   :  { %v2755_v0 = vmul.f32 %v3707_v32, %v2739_v45  ;;  %v3625_v32 = vld [vmem:[%s4481_s16] sm:$0xff]  }
0x1f65   :  { %v2763_v47 = vmul.f32 %v3152_v1, %v2755_v0 }
0x1f66   :  { %v3709_v2 = vpop.eup %3708 }
0x1f67   :  { %v2756_v21 = vmul.f32 %v3709_v2, %v2740_v52  ;;  %v2771_v48 = vadd.f32 %v3153_v3, %v2763_v47 }
0x1f69   :  { %v2764_v25 = vmul.f32 %v3152_v1, %v2756_v21 }
0x1f6b   :  { %v2772_v4 = vadd.f32 %v3153_v3, %v2764_v25 }
0x1f6d   :  { %v2773_v50 = vpack.c.bf16 %v2772_v4, %v2771_v48 }
0x1f6f   :  { %3572 = vmatmul.mubr.msk.bf16.vlgmr.msra.gmra.mxu1 %vm64_vm0, %v2773_v50  ;;  %v3180_v50 = vld [vmem:[%s4479_s14 + $0x1] ss:$0 sm:$0xff] }
0x1f70   :  { %3591 = vmatprep.mubr.msk.bf16.mxu1 %vm3723_vm1, %v3722_v14  ;;  %3588 = vmatpush3.bf16.msra.mxu1 %v3624_v63 }
0x1f71   :  { %3589 = vmatprep.subr.bf16.mxu1 %v3722_v14  ;;  %v3181_v14 = vld [vmem:[%s4480_s15 + $0x1] ss:$0 sm:$0xff] }
0x1f74   :  { %3590 = vmatpush3.bf16.msra.mxu1 %v3625_v32 }
0x202f   :  { %v2836_v9 = vpop.f32.mrf.mxu1 }
0x2030   :  { %v2837_v36 = vadd.f32 %v3159_v8, %v2836_v9 }
0x2031   :  { %v3573_v57 = vpop.f32.mrf.mxu1 }
0x2032   :  { %v2843_v23 = vmul.f32 %v2837_v36, %v2837_v36 }
0x2033   :  { %v2839_v40 = vpop.f32.mrf.mxu1 }
0x2034   :  { %v2845_v59 = vmul.f32 %v2843_v23, %v2837_v36  ;;  %v2840_v10 = vadd.f32 %v3159_v8, %v2839_v40  ;;  %v3182_v23 = vld [vmem:[%s4482_s17] ss:$0 sm:$0xff] }
0x2035   :  { %v3574_v11 = vpop.f32.mrf.mxu1 }
0x2036   :  { %v2847_v54 = vmul.f32 0.044715, %v2845_v59  ;;  %v2844_v12 = vmul.f32 %v2840_v10, %v2840_v10 }
0x2038   :  { %v2849_v13 = vadd.f32 %v2847_v54, %v2837_v36  ;;  %v2846_v42 = vmul.f32 %v2844_v12, %v2840_v10 }
0x203a   :  { %v2851_v15 = vmul.f32 0.7978846, %v2849_v13  ;;  %v2848_v16 = vmul.f32 0.044715, %v2846_v42 }
0x203c   :  { %3710 = vtanh.f32 %v2851_v15  ;;  %v2850_v19 = vadd.f32 %v2848_v16, %v2840_v10 }
0x203e   :  { %v2852_v20 = vmul.f32 0.7978846, %v2850_v19 }
0x2040   :  { %3712 = vtanh.f32 %v2852_v20 }
0x2049   :  { %v3711_v38 = vpop.eup %3710 }
0x204a   :  { %v2855_v22 = vadd.f32 1.0, %v3711_v38 }
0x204c   :  { %v2857_v26 = vmul.f32 0.5, %v2855_v22 }
0x204d   :  { %v3713_v24 = vpop.eup %3712 }
0x204e   :  { %v2856_v28 = vadd.f32 1.0, %v3713_v24  ;;  %v2859_v30 = vmul.f32 %v2857_v26, %v2837_v36 }
0x2050   :  { %v2858_v29 = vmul.f32 0.5, %v2856_v28 }
0x2052   :  { %v2860_v33 = vmul.f32 %v2858_v29, %v2840_v10 }
0x2054   :  { %v2861_v34 = vpack.c.bf16 %v2860_v33, %v2859_v30 }
0x2056   :  { %3584 = vmatmul.mubr.msk.bf16.vlgmr.msra.gmra.mxu0 %vm1457_vm4, %v2861_v34 }
0x2116   :  { %v2940_v37 = vpop.f32.mrf.mxu0 }
0x2117   :  { %v2941_v39 = vadd.f32 %v3172_v35, %v2940_v37 }
0x2118   :  { %v3585_v41 = vpop.f32.mrf.mxu0 }
0x2119   :  { %v2947_v43 = vadd.f32 %v2941_v39, %v2771_v48 }
0x211a   :  { %v2943_v44 = vpop.f32.mrf.mxu0 }
0x211b   :  { %v2944_v45 = vadd.f32 %v3172_v35, %v2943_v44  ;;  %v2953_v46 = vsel %vm64_vm0, %v2947_v43, 0.0 }
0x211c   :  { %2954 = vadd.xlane.f32.xlu1 %v2953_v46  ;;  %v3586_v49 = vpop.f32.mrf.mxu0 }
0x211d   :  { %v2948_v51 = vadd.f32 %v2944_v45, %v2772_v4 }
0x211f   :  { %v2956_v52 = vsel %vm64_vm0, %v2948_v51, 0.0 }
0x2120   :  { %2957 = vadd.xlane.f32.xlu0 %v2956_v52 }
0x21a5   :  { %v2955_v53 = vpop.xlane.xlu1 %2954 }
0x21a6   :  { %v2959_v17 = vmul.f32 0.03125, %v2955_v53 }
0x21a8   :  { %v2961_v55 = vsub.f32 %v2947_v43, %v2959_v17 }
0x21a9   :  { %v2958_v18 = vpop.xlane.xlu0 %2957 }
0x21aa   :  { %v2960_v56 = vmul.f32 0.03125, %v2958_v18  ;;  %v2963_v58 = vmul.f32 %v2961_v55, %v2961_v55 }
0x21ac   :  { %v2962_v60 = vsub.f32 %v2948_v51, %v2960_v56  ;;  %v2965_v61 = vsel %vm64_vm0, %v2963_v58, 0.0 }
0x21ad   :  { %2966 = vadd.xlane.f32.xlu1 %v2965_v61 }
0x21ae   :  { %v2964_v62 = vmul.f32 %v2962_v60, %v2962_v60 }
0x21b0   :  { %v2968_v31 = vsel %vm64_vm0, %v2964_v62, 0.0 }
0x21b1   :  { %2969 = vadd.xlane.f32.xlu0 %v2968_v31 }
0x2236   :  { %v2967_v0 = vpop.xlane.xlu1 %2966 }
0x2237   :  { %v2971_v1 = vmul.f32 0.03125, %v2967_v0 }
0x2239   :  { %v2973_v2 = vadd.f32 1e-12, %v2971_v1 }
0x223a   :  { %v2970_v21 = vpop.xlane.xlu0 %2969 }
0x223b   :  { %3714 = vrsqrt.f32 %v2973_v2  ;;  %v2972_v47 = vmul.f32 0.03125, %v2970_v21 }
0x223d   :  { %v2974_v3 = vadd.f32 1e-12, %v2972_v47 }
0x223f   :  { %3716 = vrsqrt.f32 %v2974_v3 }
0x2248   :  { %v3715_v25 = vpop.eup %3714 }
0x2249   :  { %v2977_v48 = vmul.f32 %v3715_v25, %v2961_v55 }
0x224b   :  { %v2985_v27 = vmul.f32 %v3180_v50, %v2977_v48 }
0x224c   :  { %v3717_v4 = vpop.eup %3716 }
0x224d   :  { %v2978_v5 = vmul.f32 %v3717_v4, %v2962_v60  ;;  %v2993_v8 = vadd.f32 %v3181_v14, %v2985_v27 }
0x224f   :  { %v2986_v6 = vmul.f32 %v3180_v50, %v2978_v5 }
0x2251   :  { %v2994_v7 = vadd.f32 %v3181_v14, %v2986_v6 }
0x2253   :  { %v2996_v9 = vrot.slane %v2994_v7, 7 }
0x2255   :  { %v2999_v36 = vsel %vm2998_vm5, %v2993_v8, %v2996_v9 }
0x2256   :  { %v3000_v57 = vpack.c.bf16 %v2999_v36, %v2999_v36 }
0x2258   :  { %3592 = vmatmul.mubr.msk.bf16.vlgmr.msra.gmra.mxu1 %vm64_vm0, %v3000_v57 }
0x2318   :  { %v3061_v40 = vpop.f32.mrf.mxu1 }
0x2319   :  { %v3062_v59 = vadd.f32 %v3182_v23, %v3061_v40 }
0x231a   :  { %v3593_v10 = vpop.f32.mrf.mxu1 }
0x231b   :  { %3718 = vtanh.f32 %v3062_v59 }
0x231c   :  { %v3064_v11 = vpop.f32.mrf.mxu1 }
0x231e   :  { %v3594_v54 = vpop.f32.mrf.mxu1 }
0x2328   :  { %v3719_v12 = vpop.eup %3718 }
0x2329   :  { %3069 = vst.msk [vmem:[%s4483_s18] sm:$0x3] %vm3068_vm6, %v3719_v12 }

</bundles_post_ra>
